<compile_context>
chip_gen: v6e
topology: v6e:2x2x1
jax: 0.10.0
libtpu: 0.0.40
codegen_flags: <defaults>
</compile_context>

<pallas_src>
import functools

import numpy as np
import jax
import jax.numpy as jnp
from jax.experimental import pallas as pl
from jax.experimental.pallas import tpu as pltpu


def _round_up(a, b):
    return (a + b - 1) // b * b


_MAX_TN = 4096   # softmax/CE point-tile (lanes)
_MAX_TP = 512    # lovasz point-tile (lanes); keeps the tri scratch <= 512 KiB (v7x-safe)


# ----------------------------------------------------------------------------------
# Kernel 1: fused softmax + cross-entropy stats + Lovasz error/fg production.
#   inputs : logits [C, TN] (native dtype), labels [1, TN] int32
#   outputs: err [C, TN] f32, fg [C, TN] f32, stats [C, 128] f32 per tile
#            (stats lane 0 = per-class fg count, lane 1 = CE partial, lane 2 = #valid)
# ----------------------------------------------------------------------------------
def _softmax_ce_kernel(x_ref, lab_ref, err_ref, fg_ref, stats_ref, *, ignore_index):
    x = x_ref[...].astype(jnp.float32)                       # (C, TN)
    c, tn = x.shape

    m = jnp.max(x, axis=0, keepdims=True)                    # (1, TN) sublane reduce
    ex = jnp.exp(x - m)
    s = jnp.sum(ex, axis=0, keepdims=True)
    probs = ex / s
    logp = (x - m) - jnp.log(s)

    labels = lab_ref[...]                                    # (1, TN) int32
    cls = jax.lax.broadcasted_iota(jnp.int32, (c, tn), 0)
    onehot = (cls == labels).astype(jnp.float32)             # (C, TN)
    valid = (labels != ignore_index).astype(jnp.float32)     # (1, TN)

    fg = onehot * valid                                      # ignored/padded rows -> 0
    err = jnp.abs(fg - probs) * valid                        # ignored/padded rows -> 0
    err_ref[...] = err
    fg_ref[...] = fg

    ce_part = jnp.sum(-jnp.sum(logp * onehot, axis=0, keepdims=True) * valid)
    cnt_part = jnp.sum(valid)
    fg_sum = jnp.sum(fg, axis=1, keepdims=True)              # (C, 1)

    lane = jax.lax.broadcasted_iota(jnp.int32, (c, 128), 1)
    stats_ref[...] = jnp.where(
        lane == 0, fg_sum,
        jnp.where(lane == 1, ce_part,
                  jnp.where(lane == 2, cnt_part, 0.0)))


def _softmax_ce_call(x_t, lab, ignore_index, tn):
    c, n_pad = x_t.shape
    g = n_pad // tn
    kernel = functools.partial(_softmax_ce_kernel, ignore_index=ignore_index)
    return pl.pallas_call(
        kernel,
        out_shape=(jax.ShapeDtypeStruct((c, n_pad), jnp.float32),
                   jax.ShapeDtypeStruct((c, n_pad), jnp.float32),
                   jax.ShapeDtypeStruct((c, g * 128), jnp.float32)),
        grid=(g,),
        in_specs=[pl.BlockSpec((c, tn), lambda i: (0, i)),
                  pl.BlockSpec((1, tn), lambda i: (0, i))],
        out_specs=(pl.BlockSpec((c, tn), lambda i: (0, i)),
                   pl.BlockSpec((c, tn), lambda i: (0, i)),
                   pl.BlockSpec((c, 128), lambda i: (0, i))),
        compiler_params=pltpu.CompilerParams(
            dimension_semantics=("parallel",),
            vmem_limit_bytes=32 * 1024 * 1024),
    )(x_t, lab)


# ----------------------------------------------------------------------------------
# Kernel 2: Lovasz gradient + per-class dot, tiled along the (sorted) point axis.
#   per-tile inclusive cumsum of fg via one bf16 MXU matmul (tri built once in scratch);
#   global cumulative fg carried in a (C,1) VMEM scratch across sequential grid steps.
# ----------------------------------------------------------------------------------
def _lovasz_kernel(gts_ref, err_ref, fg_ref, loss_ref, tri_ref, carry_ref):
    i = pl.program_id(0)
    c, tp = err_ref.shape

    @pl.when(i == 0)
    def _():
        row = jax.lax.broadcasted_iota(jnp.int32, (tp, tp), 0)
        col = jax.lax.broadcasted_iota(jnp.int32, (tp, tp), 1)
        tri_ref[...] = (row <= col).astype(jnp.bfloat16)      # upper-triangular, once
        carry_ref[...] = jnp.zeros_like(carry_ref)
        loss_ref[...] = jnp.zeros_like(loss_ref)

    err = err_ref[...]                                        # (C, TP) sorted desc
    fg = fg_ref[...]                                          # (C, TP) same permutation
    gts = gts_ref[...]                                        # (C, 1) total fg per class

    # in-tile inclusive cumsum (exact: 0/1 operands, f32 accumulation)
    cs = jnp.dot(fg.astype(jnp.bfloat16), tri_ref[...],
                 preferred_element_type=jnp.float32)
    cum_fg = carry_ref[...] + cs                              # global inclusive cumsum

    lane = jax.lax.broadcasted_iota(jnp.int32, (c, tp), 1)
    pos = (i * tp + lane + 1).astype(jnp.float32)             # 1-based global position

    # jaccard at this position; cum_notfg = pos - cum_fg (no second matmul)
    jac = 1.0 - (gts - cum_fg) / (gts + (pos - cum_fg))
    # jaccard at the previous position via exclusive counts (0 at the global first
    # position of present classes; clamped for absent classes so no 0/0)
    cum_fg_ex = cum_fg - fg
    union_ex = gts + (pos - 1.0) - cum_fg_ex
    jac_prev = jnp.where(union_ex > 0.0,
                         1.0 - (gts - cum_fg_ex) / jnp.maximum(union_ex, 1.0),
                         0.0)

    loss_ref[...] += jnp.sum(err * (jac - jac_prev), axis=1, keepdims=True)
    carry_ref[...] = carry_ref[...] + cs[:, tp - 1:tp]


def _lovasz_call(err_s, fg_s, gts, tp):
    c, n_pad = err_s.shape
    g = n_pad // tp
    return pl.pallas_call(
        _lovasz_kernel,
        out_shape=jax.ShapeDtypeStruct((c, 1), jnp.float32),
        grid=(g,),
        in_specs=[pl.BlockSpec((c, 1), lambda i: (0, 0)),
                  pl.BlockSpec((c, tp), lambda i: (0, i)),
                  pl.BlockSpec((c, tp), lambda i: (0, i))],
        out_specs=pl.BlockSpec((c, 1), lambda i: (0, 0)),
        scratch_shapes=[pltpu.VMEM((tp, tp), jnp.bfloat16),
                        pltpu.VMEM((c, 1), jnp.float32)],
        compiler_params=pltpu.CompilerParams(
            dimension_semantics=("arbitrary",),
            vmem_limit_bytes=32 * 1024 * 1024),
    )(gts, err_s, fg_s)


# ----------------------------------------------------------------------------------
# CE + Lovasz for one [N, C] logits / [N] labels pair
# ----------------------------------------------------------------------------------
@functools.partial(jax.jit, static_argnums=(2,))
def _ce_and_lovasz_2d(x, labels, ignore_index):
    n, c = x.shape

    # tile sizes (tp | tn, both multiples of 128) and padding to a tile multiple;
    # padded points get label == ignore_index so they contribute exactly 0 everywhere.
    tp = _MAX_TP if n >= _MAX_TP else _round_up(n, 128)
    tn = _MAX_TN if n >= _MAX_TN else tp
    n_pad = _round_up(n, tn)

    x_t = jnp.transpose(x)                          # point-on-lane layout: (C, N)
    lab = labels.astype(jnp.int32)
    pad = n_pad - n
    if pad:
        x_t = jnp.pad(x_t, ((0, 0), (0, pad)))
        lab = jnp.pad(lab, (0, pad), constant_values=ignore_index)
    lab = lab.reshape(1, n_pad)

    err, fg, stats = _softmax_ce_call(x_t, lab, ignore_index, tn)

    g1 = n_pad // tn
    stats = stats.reshape(c, g1, 128)
    gts = jnp.sum(stats[:, :, 0], axis=1)           # (C,) per-class foreground counts
    ce_sum = jnp.sum(stats[0, :, 1])
    cnt = jnp.sum(stats[0, :, 2])
    ce = ce_sum / cnt                               # NaN if no valid label (== torch)

    # TODO(synk): descending sort (torch.sort) has no clean Pallas/Mosaic lowering;
    # one XLA lax.sort pass co-sorts fg with the (negated) error keys.
    neg_err_s, fg_s = jax.lax.sort((-err, fg), dimension=1, num_keys=1)
    err_s = -neg_err_s

    losses = _lovasz_call(err_s, fg_s, gts.reshape(c, 1), tp)[:, 0]   # (C,)
    present = gts > 0                                                  # classes='present'
    n_present = jnp.sum(present.astype(jnp.float32))
    lovz = jnp.where(
        n_present > 0,
        jnp.sum(jnp.where(present, losses, 0.0)) / jnp.maximum(n_present, 1.0),
        0.0)
    return ce, lovz


# ----------------------------------------------------------------------------------
# Module forward: MixLCLovaszCrossEntropy.forward({'x_vox','x_pix'}, y)
# ----------------------------------------------------------------------------------
def mix_lc_lovasz_cross_entropy(x_vox, x_pix, y, ignore_index=0):
    def _flatten(x, lab):
        if x.ndim == 4:                              # (B, C, H, W) -> (B*H*W, C)
            b, c, h, w = x.shape
            x = jnp.transpose(x, (0, 2, 3, 1)).reshape(-1, c)
            lab = lab.reshape(-1)
        return x, lab

    xv, yv = _flatten(x_vox, y)
    xp, yp = _flatten(x_pix, y)

    ce_vox, lovz_vox = _ce_and_lovasz_2d(xv, yv, ignore_index)
    ce_pix, lovz_pix = _ce_and_lovasz_2d(xp, yp, ignore_index)

    return {'predict_vox': ce_vox, 'lovz_vox': lovz_vox,
            'predict_pix': ce_pix, 'lovz_pix': lovz_pix}


# ----------------------------------------------------------------------------------
# Pure-numpy reference (direct translation of the PyTorch semantics)
# ----------------------------------------------------------------------------------
def _np_log_softmax(x):
    m = x.max(axis=1, keepdims=True)
    e = np.exp(x - m)
    return x - m - np.log(e.sum(axis=1, keepdims=True))


def _np_ce(x, y, ignore):
    lp = _np_log_softmax(x)
    valid = y != ignore
    return float((-lp[valid, y[valid]]).sum() / valid.sum())


def _np_lovasz(probs, labels, ignore):
    valid = labels != ignore
    vp, vl = probs[valid], labels[valid]
    C = probs.shape[1]
    losses = []
    for c in range(C):
        fg = (vl == c).astype(np.float64)
        if fg.sum() == 0:
            continue
        errors = np.abs(fg - vp[:, c])
        order = np.argsort(-errors, kind="stable")
        es, fs = errors[order], fg[order]
        gts = fs.sum()
        inter = gts - np.cumsum(fs)
        union = gts + np.cumsum(1.0 - fs)
        jac = 1.0 - inter / union
        jac[1:] = jac[1:] - jac[:-1]
        losses.append(float(np.dot(es, jac)))
    return float(np.mean(losses)) if losses else 0.0


def _np_forward(x_vox, x_pix, y, ignore=0):
    def flat(x, lab):
        if x.ndim == 4:
            b, c, h, w = x.shape
            x = np.transpose(x, (0, 2, 3, 1)).reshape(-1, c)
            lab = lab.reshape(-1)
        return x, lab
    xv, yv = flat(x_vox, y)
    xp, yp = flat(x_pix, y)
    pv = np.exp(_np_log_softmax(xv))
    pp = np.exp(_np_log_softmax(xp))
    return {'predict_vox': _np_ce(xv, yv, ignore),
            'lovz_vox': _np_lovasz(pv, yv, ignore),
            'predict_pix': _np_ce(xp, yp, ignore),
            'lovz_pix': _np_lovasz(pp, yp, ignore)}


if __name__ == "__main__":
    B, C, H, W = 2, 16, 23, 29          # N = 1334 points -> padded to 1536, 3 tiles
    IGNORE = 0

    key = jax.random.PRNGKey(0)
    k1, k2, k3 = jax.random.split(key, 3)
    x_vox = jax.random.normal(k1, (B, C, H, W), dtype=jnp.float32)
    x_pix = jax.random.normal(k2, (B, C, H, W), dtype=jnp.float32)
    y = jax.random.randint(k3, (B, H, W), 0, C, dtype=jnp.int32)

    out = mix_lc_lovasz_cross_entropy(x_vox, x_pix, y, ignore_index=IGNORE)
    out = jax.tree_util.tree_map(jax.block_until_ready, out)

    ref = _np_forward(np.asarray(x_vox, np.float64), np.asarray(x_pix, np.float64),
                      np.asarray(y), ignore=IGNORE)
    for k in ref:
        np.testing.assert_allclose(float(out[k]), ref[k], rtol=2e-3, atol=5e-4)

    print("KERNEL_OK")
</pallas_src>

<mosaic_0001>
module attributes {stable_mosaic.version = 11 : i64} {
  func.func @_softmax_ce_kernel(%arg0: i32, %arg1: memref<16x512xf32, #tpu.memory_space<vmem>>, %arg2: memref<1x512xi32, #tpu.memory_space<vmem>>, %arg3: memref<16x512xf32, #tpu.memory_space<vmem>>, %arg4: memref<16x512xf32, #tpu.memory_space<vmem>>, %arg5: memref<16x128xf32, #tpu.memory_space<vmem>>) attributes {dimension_semantics = [#tpu.dimension_semantics<parallel>], iteration_bounds = array<i64: 3>, scalar_prefetch = 0 : i64, scratch_operands = 0 : i64, tpu.core_type = #tpu.core_type<tc>, window_params = [{transform_indices = @transform_0, window_bounds = array<i64: 16, 512>}, {transform_indices = @transform_1, window_bounds = array<i64: 1, 512>}, {transform_indices = @transform_2, window_bounds = array<i64: 16, 512>}, {transform_indices = @transform_3, window_bounds = array<i64: 16, 512>}, {transform_indices = @transform_4, window_bounds = array<i64: 16, 128>}]} {
    %c0 = arith.constant 0 : index
    %c0_0 = arith.constant 0 : index
    %0 = vector.load %arg1[%c0, %c0_0] : memref<16x512xf32, #tpu.memory_space<vmem>>, vector<16x512xf32>
    %cst = arith.constant dense<0xFF800000> : vector<512xf32>
    %1 = vector.multi_reduction <maximumf>, %0, %cst [0] : vector<16x512xf32> to vector<512xf32>
    %2 = vector.shape_cast %1 : vector<512xf32> to vector<1x512xf32>
    %3 = vector.broadcast %2 : vector<1x512xf32> to vector<16x512xf32>
    %4 = arith.subf %0, %3 : vector<16x512xf32>
    %5 = math.exp %4 : vector<16x512xf32>
    %cst_1 = arith.constant dense<0.000000e+00> : vector<512xf32>
    %6 = vector.multi_reduction <add>, %5, %cst_1 [0] : vector<16x512xf32> to vector<512xf32>
    %7 = vector.shape_cast %6 : vector<512xf32> to vector<1x512xf32>
    %8 = vector.broadcast %7 : vector<1x512xf32> to vector<16x512xf32>
    %9 = arith.divf %5, %8 : vector<16x512xf32>
    %10 = vector.broadcast %2 : vector<1x512xf32> to vector<16x512xf32>
    %11 = arith.subf %0, %10 : vector<16x512xf32>
    %12 = math.log %7 : vector<1x512xf32>
    %13 = vector.broadcast %12 : vector<1x512xf32> to vector<16x512xf32>
    %14 = arith.subf %11, %13 : vector<16x512xf32>
    %c0_2 = arith.constant 0 : index
    %c0_3 = arith.constant 0 : index
    %15 = vector.load %arg2[%c0_2, %c0_3] : memref<1x512xi32, #tpu.memory_space<vmem>>, vector<1x512xi32>
    %16 = tpu.iota {dimensions = array<i32: 0>} : vector<16x512xi32>
    %17 = vector.broadcast %15 : vector<1x512xi32> to vector<16x512xi32>
    %18 = arith.cmpi eq, %16, %17 : vector<16x512xi32>
    %19 = arith.extui %18 : vector<16x512xi1> to vector<16x512xi32>
    %20 = arith.sitofp %19 : vector<16x512xi32> to vector<16x512xf32>
    %c0_i32 = arith.constant 0 : i32
    %21 = vector.broadcast %c0_i32 : i32 to vector<1x512xi32>
    %22 = arith.cmpi ne, %15, %21 : vector<1x512xi32>
    %23 = arith.extui %22 : vector<1x512xi1> to vector<1x512xi32>
    %24 = arith.sitofp %23 : vector<1x512xi32> to vector<1x512xf32>
    %25 = vector.broadcast %24 : vector<1x512xf32> to vector<16x512xf32>
    %26 = arith.mulf %20, %25 : vector<16x512xf32>
    %27 = arith.subf %26, %9 : vector<16x512xf32>
    %28 = math.absf %27 : vector<16x512xf32>
    %29 = vector.broadcast %24 : vector<1x512xf32> to vector<16x512xf32>
    %30 = arith.mulf %28, %29 : vector<16x512xf32>
    %c0_4 = arith.constant 0 : index
    %c0_5 = arith.constant 0 : index
    %31 = vector.load %arg3[%c0_4, %c0_5] : memref<16x512xf32, #tpu.memory_space<vmem>>, vector<16x512xf32>
    tpu.vector_store %arg3[%c0_4, %c0_5], %30 {strides = array<i32>} : memref<16x512xf32, #tpu.memory_space<vmem>>, vector<16x512xf32>,
    %c0_6 = arith.constant 0 : index
    %c0_7 = arith.constant 0 : index
    %32 = vector.load %arg4[%c0_6, %c0_7] : memref<16x512xf32, #tpu.memory_space<vmem>>, vector<16x512xf32>
    tpu.vector_store %arg4[%c0_6, %c0_7], %26 {strides = array<i32>} : memref<16x512xf32, #tpu.memory_space<vmem>>, vector<16x512xf32>,
    %33 = arith.mulf %14, %20 : vector<16x512xf32>
    %cst_8 = arith.constant dense<0.000000e+00> : vector<512xf32>
    %34 = vector.multi_reduction <add>, %33, %cst_8 [0] : vector<16x512xf32> to vector<512xf32>
    %35 = vector.shape_cast %34 : vector<512xf32> to vector<1x512xf32>
    %cst_9 = arith.constant 0.000000e+00 : f32
    %36 = vector.broadcast %cst_9 : f32 to vector<1x512xf32>
    %37 = arith.subf %36, %35 : vector<1x512xf32>
    %38 = arith.mulf %37, %24 : vector<1x512xf32>
    %39 = vector.shape_cast %38 : vector<1x512xf32> to vector<1x1x512xf32>
    %cst_10 = arith.constant dense<0.000000e+00> : vector<1xf32>
    %40 = vector.multi_reduction <add>, %39, %cst_10 [1, 2] : vector<1x1x512xf32> to vector<1xf32>
    %41 = vector.shape_cast %40 : vector<1xf32> to vector<1x1x1xf32>
    %42 = vector.extract %41[0, 0, 0] : f32 from vector<1x1x1xf32>
    %43 = vector.shape_cast %24 : vector<1x512xf32> to vector<1x1x512xf32>
    %cst_11 = arith.constant dense<0.000000e+00> : vector<1xf32>
    %44 = vector.multi_reduction <add>, %43, %cst_11 [1, 2] : vector<1x1x512xf32> to vector<1xf32>
    %45 = vector.shape_cast %44 : vector<1xf32> to vector<1x1x1xf32>
    %46 = vector.extract %45[0, 0, 0] : f32 from vector<1x1x1xf32>
    %cst_12 = arith.constant dense<0.000000e+00> : vector<16xf32>
    %47 = vector.multi_reduction <add>, %26, %cst_12 [1] : vector<16x512xf32> to vector<16xf32>
    %48 = vector.shape_cast %47 : vector<16xf32> to vector<16x1xf32>
    %49 = tpu.iota {dimensions = array<i32: 1>} : vector<16x128xi32>
    %c0_i32_13 = arith.constant 0 : i32
    %50 = vector.broadcast %c0_i32_13 : i32 to vector<16x128xi32>
    %51 = arith.cmpi eq, %49, %50 : vector<16x128xi32>
    %c1_i32 = arith.constant 1 : i32
    %52 = vector.broadcast %c1_i32 : i32 to vector<16x128xi32>
    %53 = arith.cmpi eq, %49, %52 : vector<16x128xi32>
    %c2_i32 = arith.constant 2 : i32
    %54 = vector.broadcast %c2_i32 : i32 to vector<16x128xi32>
    %55 = arith.cmpi eq, %49, %54 : vector<16x128xi32>
    %cst_14 = arith.constant 0.000000e+00 : f32
    %56 = vector.broadcast %46 : f32 to vector<16x128xf32>
    %57 = vector.broadcast %cst_14 : f32 to vector<16x128xf32>
    %58 = arith.select %55, %56, %57 : vector<16x128xi1>, vector<16x128xf32>
    %59 = vector.broadcast %42 : f32 to vector<16x128xf32>
    %60 = arith.select %53, %59, %58 : vector<16x128xi1>, vector<16x128xf32>
    %61 = vector.shape_cast %48 : vector<16x1xf32> to vector<16x1xf32>
    %62 = vector.broadcast %61 : vector<16x1xf32> to vector<16x128xf32>
    %63 = arith.select %51, %62, %60 : vector<16x128xi1>, vector<16x128xf32>
    %c0_15 = arith.constant 0 : index
    %c0_16 = arith.constant 0 : index
    %64 = vector.load %arg5[%c0_15, %c0_16] : memref<16x128xf32, #tpu.memory_space<vmem>>, vector<16x128xf32>
    tpu.vector_store %arg5[%c0_15, %c0_16], %63 {strides = array<i32>} : memref<16x128xf32, #tpu.memory_space<vmem>>, vector<16x128xf32>,
    return
  }
  func.func @transform_0(%arg0: i32) -> (i32, i32) {
    %c0_i32 = arith.constant 0 : i32
    %c0_i32_0 = arith.constant 0 : i32
    return %c0_i32, %arg0 : i32, i32
  }
  func.func @transform_1(%arg0: i32) -> (i32, i32) {
    %c0_i32 = arith.constant 0 : i32
    %c0_i32_0 = arith.constant 0 : i32
    return %c0_i32, %arg0 : i32, i32
  }
  func.func @transform_2(%arg0: i32) -> (i32, i32) {
    %c0_i32 = arith.constant 0 : i32
    %c0_i32_0 = arith.constant 0 : i32
    return %c0_i32, %arg0 : i32, i32
  }
  func.func @transform_3(%arg0: i32) -> (i32, i32) {
    %c0_i32 = arith.constant 0 : i32
    %c0_i32_0 = arith.constant 0 : i32
    return %c0_i32, %arg0 : i32, i32
  }
  func.func @transform_4(%arg0: i32) -> (i32, i32) {
    %c0_i32 = arith.constant 0 : i32
    %c0_i32_0 = arith.constant 0 : i32
    return %c0_i32, %arg0 : i32, i32
  }
}

module attributes {stable_mosaic.version = 11 : i64} {
  func.func @_lovasz_kernel(%arg0: i32, %arg1: memref<16x1xf32, #tpu.memory_space<vmem>>, %arg2: memref<16x512xf32, #tpu.memory_space<vmem>>, %arg3: memref<16x512xf32, #tpu.memory_space<vmem>>, %arg4: memref<16x1xf32, #tpu.memory_space<vmem>>, %arg5: memref<512x512xbf16, #tpu.memory_space<vmem>>, %arg6: memref<16x1xf32, #tpu.memory_space<vmem>>) attributes {dimension_semantics = [#tpu.dimension_semantics<arbitrary>], iteration_bounds = array<i64: 3>, scalar_prefetch = 0 : i64, scratch_operands = 2 : i64, tpu.core_type = #tpu.core_type<tc>, window_params = [{pipeline_mode = #tpu.pipeline_mode<synchronous>, transform_indices = @transform_0, window_bounds = array<i64: 16, 1>}, {transform_indices = @transform_1, window_bounds = array<i64: 16, 512>}, {transform_indices = @transform_2, window_bounds = array<i64: 16, 512>}, {pipeline_mode = #tpu.pipeline_mode<synchronous>, transform_indices = @transform_3, window_bounds = array<i64: 16, 1>}]} {
    %c0_i32 = arith.constant 0 : i32
    %0 = arith.cmpi eq, %arg0, %c0_i32 : i32
    %1 = arith.extui %0 : i1 to i32
    %c0_i32_0 = arith.constant 0 : i32
    %2 = arith.cmpi ne, %1, %c0_i32_0 : i32
    scf.if %2 {
      %55 = tpu.iota {dimensions = array<i32: 0>} : vector<512x512xi32>
      %56 = tpu.iota {dimensions = array<i32: 1>} : vector<512x512xi32>
      %57 = arith.cmpi sle, %55, %56 : vector<512x512xi32>
      %58 = arith.extui %57 : vector<512x512xi1> to vector<512x512xi32>
      %59 = arith.sitofp %58 : vector<512x512xi32> to vector<512x512xf32>
      %60 = arith.truncf %59 : vector<512x512xf32> to vector<512x512xbf16>
      %c0_25 = arith.constant 0 : index
      %c0_26 = arith.constant 0 : index
      %61 = vector.load %arg5[%c0_25, %c0_26] : memref<512x512xbf16, #tpu.memory_space<vmem>>, vector<512x512xbf16>
      tpu.vector_store %arg5[%c0_25, %c0_26], %60 {strides = array<i32>} : memref<512x512xbf16, #tpu.memory_space<vmem>>, vector<512x512xbf16>,
      %cst_27 = arith.constant 0.000000e+00 : f32
      %62 = vector.broadcast %cst_27 : f32 to vector<16x1xf32>
      %c0_28 = arith.constant 0 : index
      %c0_29 = arith.constant 0 : index
      %63 = vector.load %arg6[%c0_28, %c0_29] : memref<16x1xf32, #tpu.memory_space<vmem>>, vector<16x1xf32>
      tpu.vector_store %arg6[%c0_28, %c0_29], %62 {strides = array<i32>} : memref<16x1xf32, #tpu.memory_space<vmem>>, vector<16x1xf32>,
      %cst_30 = arith.constant 0.000000e+00 : f32
      %64 = vector.broadcast %cst_30 : f32 to vector<16x1xf32>
      %c0_31 = arith.constant 0 : index
      %c0_32 = arith.constant 0 : index
      %65 = vector.load %arg4[%c0_31, %c0_32] : memref<16x1xf32, #tpu.memory_space<vmem>>, vector<16x1xf32>
      tpu.vector_store %arg4[%c0_31, %c0_32], %64 {strides = array<i32>} : memref<16x1xf32, #tpu.memory_space<vmem>>, vector<16x1xf32>,
    } else {
    }
    %c0 = arith.constant 0 : index
    %c0_1 = arith.constant 0 : index
    %3 = vector.load %arg2[%c0, %c0_1] : memref<16x512xf32, #tpu.memory_space<vmem>>, vector<16x512xf32>
    %c0_2 = arith.constant 0 : index
    %c0_3 = arith.constant 0 : index
    %4 = vector.load %arg3[%c0_2, %c0_3] : memref<16x512xf32, #tpu.memory_space<vmem>>, vector<16x512xf32>
    %c0_4 = arith.constant 0 : index
    %c0_5 = arith.constant 0 : index
    %5 = vector.load %arg1[%c0_4, %c0_5] : memref<16x1xf32, #tpu.memory_space<vmem>>, vector<16x1xf32>
    %6 = arith.truncf %4 : vector<16x512xf32> to vector<16x512xbf16>
    %c0_6 = arith.constant 0 : index
    %c0_7 = arith.constant 0 : index
    %7 = vector.load %arg5[%c0_6, %c0_7] : memref<512x512xbf16, #tpu.memory_space<vmem>>, vector<512x512xbf16>
    %cst = arith.constant dense<0.000000e+00> : vector<16x512xf32>
    %8 = tpu.matmul %6, %7, %cst {dimension_numbers = #tpu.dot_dimension_numbers<[1], [0], [0], [1], [0, 0, 1, 1], [], []>} : vector<16x512xbf16>, vector<512x512xbf16>, vector<16x512xf32> -> vector<16x512xf32>
    %c0_8 = arith.constant 0 : index
    %c0_9 = arith.constant 0 : index
    %9 = vector.load %arg6[%c0_8, %c0_9] : memref<16x1xf32, #tpu.memory_space<vmem>>, vector<16x1xf32>
    %10 = vector.broadcast %9 : vector<16x1xf32> to vector<16x512xf32>
    %11 = arith.addf %10, %8 : vector<16x512xf32>
    %12 = tpu.iota {dimensions = array<i32: 1>} : vector<16x512xi32>
    %c512_i32 = arith.constant 512 : i32
    %13 = arith.muli %arg0, %c512_i32 : i32
    %14 = vector.broadcast %13 : i32 to vector<16x512xi32>
    %15 = arith.addi %14, %12 : vector<16x512xi32>
    %c1_i32 = arith.constant 1 : i32
    %16 = vector.broadcast %c1_i32 : i32 to vector<16x512xi32>
    %17 = arith.addi %15, %16 : vector<16x512xi32>
    %18 = arith.sitofp %17 : vector<16x512xi32> to vector<16x512xf32>
    %19 = vector.broadcast %5 : vector<16x1xf32> to vector<16x512xf32>
    %20 = arith.subf %19, %11 : vector<16x512xf32>
    %21 = arith.subf %18, %11 : vector<16x512xf32>
    %22 = vector.broadcast %5 : vector<16x1xf32> to vector<16x512xf32>
    %23 = arith.addf %22, %21 : vector<16x512xf32>
    %24 = arith.divf %20, %23 : vector<16x512xf32>
    %cst_10 = arith.constant 1.000000e+00 : f32
    %25 = vector.broadcast %cst_10 : f32 to vector<16x512xf32>
    %26 = arith.subf %25, %24 : vector<16x512xf32>
    %27 = arith.subf %11, %4 : vector<16x512xf32>
    %cst_11 = arith.constant 1.000000e+00 : f32
    %28 = vector.broadcast %cst_11 : f32 to vector<16x512xf32>
    %29 = arith.subf %18, %28 : vector<16x512xf32>
    %30 = vector.broadcast %5 : vector<16x1xf32> to vector<16x512xf32>
    %31 = arith.addf %30, %29 : vector<16x512xf32>
    %32 = arith.subf %31, %27 : vector<16x512xf32>
    %cst_12 = arith.constant 0.000000e+00 : f32
    %33 = vector.broadcast %cst_12 : f32 to vector<16x512xf32>
    %34 = arith.cmpf ogt, %32, %33 : vector<16x512xf32>
    %35 = vector.broadcast %5 : vector<16x1xf32> to vector<16x512xf32>
    %36 = arith.subf %35, %27 : vector<16x512xf32>
    %cst_13 = arith.constant 1.000000e+00 : f32
    %37 = vector.broadcast %cst_13 : f32 to vector<16x512xf32>
    %38 = arith.maximumf %32, %37 : vector<16x512xf32>
    %39 = arith.divf %36, %38 : vector<16x512xf32>
    %cst_14 = arith.constant 1.000000e+00 : f32
    %40 = vector.broadcast %cst_14 : f32 to vector<16x512xf32>
    %41 = arith.subf %40, %39 : vector<16x512xf32>
    %cst_15 = arith.constant 0.000000e+00 : f32
    %42 = vector.broadcast %cst_15 : f32 to vector<16x512xf32>
    %43 = arith.select %34, %41, %42 : vector<16x512xi1>, vector<16x512xf32>
    %c0_16 = arith.constant 0 : index
    %c0_17 = arith.constant 0 : index
    %44 = vector.load %arg4[%c0_16, %c0_17] : memref<16x1xf32, #tpu.memory_space<vmem>>, vector<16x1xf32>
    %45 = arith.subf %26, %43 : vector<16x512xf32>
    %46 = arith.mulf %3, %45 : vector<16x512xf32>
    %cst_18 = arith.constant dense<0.000000e+00> : vector<16xf32>
    %47 = vector.multi_reduction <add>, %46, %cst_18 [1] : vector<16x512xf32> to vector<16xf32>
    %48 = vector.shape_cast %47 : vector<16xf32> to vector<16x1xf32>
    %49 = arith.addf %44, %48 : vector<16x1xf32>
    %c0_19 = arith.constant 0 : index
    %c0_20 = arith.constant 0 : index
    %50 = vector.load %arg4[%c0_19, %c0_20] : memref<16x1xf32, #tpu.memory_space<vmem>>, vector<16x1xf32>
    tpu.vector_store %arg4[%c0_19, %c0_20], %49 {strides = array<i32>} : memref<16x1xf32, #tpu.memory_space<vmem>>, vector<16x1xf32>,
    %c0_21 = arith.constant 0 : index
    %c0_22 = arith.constant 0 : index
    %51 = vector.load %arg6[%c0_21, %c0_22] : memref<16x1xf32, #tpu.memory_space<vmem>>, vector<16x1xf32>
    %52 = vector.extract_strided_slice %8 {offsets = [0, 511], sizes = [16, 1], strides = [1, 1]} : vector<16x512xf32> to vector<16x1xf32>
    %53 = arith.addf %51, %52 : vector<16x1xf32>
    %c0_23 = arith.constant 0 : index
    %c0_24 = arith.constant 0 : index
    %54 = vector.load %arg6[%c0_23, %c0_24] : memref<16x1xf32, #tpu.memory_space<vmem>>, vector<16x1xf32>
    tpu.vector_store %arg6[%c0_23, %c0_24], %53 {strides = array<i32>} : memref<16x1xf32, #tpu.memory_space<vmem>>, vector<16x1xf32>,
    return
  }
  func.func @transform_0(%arg0: i32) -> (i32, i32) {
    %c0_i32 = arith.constant 0 : i32
    %c0_i32_0 = arith.constant 0 : i32
    %c0_i32_1 = arith.constant 0 : i32
    return %c0_i32, %c0_i32_0 : i32, i32
  }
  func.func @transform_1(%arg0: i32) -> (i32, i32) {
    %c0_i32 = arith.constant 0 : i32
    %c0_i32_0 = arith.constant 0 : i32
    return %c0_i32, %arg0 : i32, i32
  }
  func.func @transform_2(%arg0: i32) -> (i32, i32) {
    %c0_i32 = arith.constant 0 : i32
    %c0_i32_0 = arith.constant 0 : i32
    return %c0_i32, %arg0 : i32, i32
  }
  func.func @transform_3(%arg0: i32) -> (i32, i32) {
    %c0_i32 = arith.constant 0 : i32
    %c0_i32_0 = arith.constant 0 : i32
    %c0_i32_1 = arith.constant 0 : i32
    return %c0_i32, %c0_i32_0 : i32, i32
  }
}

</mosaic_0001>

<bundles_post_ra>
// kernel: neg.2
= control target key start
LH: loop header
LB: loop body
LE: loop exit
PB: predicated region body
PF: predicated region fallthrough
CT: control target
= control target key end

     0   :  { %s392_s0 = inlined_call_operand.vmem [shape: f32[16,1536], index: 0, kind: input, shape index: {}]   ;;  %s393_s1 = inlined_call_operand.vmem [shape: f32[16,1536], index: 1, kind: output, shape index: {}]  }
   0x1   :  { %v2_v0 = vld [vmem:[%s392_s0] sm:$0xff]  ;;  %v194_v2 = vld [vmem:[%s392_s0 + $0x8] sm:$0xff]  ;;  %v198_v7 = vld [vmem:[%s392_s0 + $0x10] sm:$0xff] }
   0x2   :  { %v192_v1 = vld [vmem:[%s392_s0 + $0x60] sm:$0xff]  ;;  %v5_v3 = vxor.u32 2147483648, %v2_v0  ;;  %v20_v5 = vxor.u32 2147483648, %v194_v2  ;;  %v196_v6 = vld [vmem:[%s392_s0 + $0x68] sm:$0xff]  ;;  %v200_v8 = vld [vmem:[%s392_s0 + $0x70] sm:$0xff]  ;;  %v36_v10 = vxor.u32 2147483648, %v198_v7 }
   0x3   :  { %v12_v4 = vxor.u32 2147483648, %v192_v1  ;;  %v28_v9 = vxor.u32 2147483648, %v196_v6  ;;  %v44_v11 = vxor.u32 2147483648, %v200_v8  ;;  %v202_v12 = vld [vmem:[%s392_s0 + $0x18] sm:$0xff]  ;;  %v206_v14 = vld [vmem:[%s392_s0 + $0x20] sm:$0xff]  ;;  %v210_v19 = vld [vmem:[%s392_s0 + $0x28] sm:$0xff] }
   0x4   :  { %v204_v13 = vld [vmem:[%s392_s0 + $0x78] sm:$0xff]  ;;  %7 = vst [vmem:[%s393_s1] sm:$0xff] %v5_v3  ;;  %195 = vst [vmem:[%s393_s1 + $0x8] sm:$0xff] %v20_v5  ;;  %v52_v15 = vxor.u32 2147483648, %v202_v12  ;;  %v68_v17 = vxor.u32 2147483648, %v206_v14  ;;  %v208_v18 = vld [vmem:[%s392_s0 + $0x80] sm:$0xff]  ;;  %v84_v22 = vxor.u32 2147483648, %v210_v19 }
   0x5   :  { %193 = vst [vmem:[%s393_s1 + $0x60] sm:$0xff] %v12_v4  ;;  %v60_v16 = vxor.u32 2147483648, %v204_v13  ;;  %v212_v20 = vld [vmem:[%s392_s0 + $0x88] sm:$0xff]  ;;  %197 = vst [vmem:[%s393_s1 + $0x68] sm:$0xff] %v28_v9  ;;  %v76_v21 = vxor.u32 2147483648, %v208_v18  ;;  %v214_v24 = vld [vmem:[%s392_s0 + $0x30] sm:$0xff] }
   0x6   :  { %199 = vst [vmem:[%s393_s1 + $0x10] sm:$0xff] %v36_v10  ;;  %201 = vst [vmem:[%s393_s1 + $0x70] sm:$0xff] %v44_v11  ;;  %v92_v23 = vxor.u32 2147483648, %v212_v20  ;;  %v216_v25 = vld [vmem:[%s392_s0 + $0x90] sm:$0xff]  ;;  %v218_v26 = vld [vmem:[%s392_s0 + $0x38] sm:$0xff]  ;;  %v100_v27 = vxor.u32 2147483648, %v214_v24 }
   0x7   :  { %203 = vst [vmem:[%s393_s1 + $0x18] sm:$0xff] %v52_v15  ;;  %205 = vst [vmem:[%s393_s1 + $0x78] sm:$0xff] %v60_v16  ;;  %v108_v28 = vxor.u32 2147483648, %v216_v25  ;;  %v116_v29 = vxor.u32 2147483648, %v218_v26  ;;  %v220_v30 = vld [vmem:[%s392_s0 + $0x98] sm:$0xff]  ;;  %v222_v31 = vld [vmem:[%s392_s0 + $0x40] sm:$0xff] }
   0x8   :  { %207 = vst [vmem:[%s393_s1 + $0x20] sm:$0xff] %v68_v17  ;;  %v224_v32 = vld [vmem:[%s392_s0 + $0xa0] sm:$0xff]  ;;  %209 = vst [vmem:[%s393_s1 + $0x80] sm:$0xff] %v76_v21  ;;  %v124_v33 = vxor.u32 2147483648, %v220_v30  ;;  %v132_v34 = vxor.u32 2147483648, %v222_v31  ;;  %v226_v36 = vld [vmem:[%s392_s0 + $0x48] sm:$0xff] }
   0x9   :  { %211 = vst [vmem:[%s393_s1 + $0x28] sm:$0xff] %v84_v22  ;;  %213 = vst [vmem:[%s393_s1 + $0x88] sm:$0xff] %v92_v23  ;;  %v140_v35 = vxor.u32 2147483648, %v224_v32  ;;  %v228_v37 = vld [vmem:[%s392_s0 + $0xa8] sm:$0xff]  ;;  %v230_v38 = vld [vmem:[%s392_s0 + $0x50] sm:$0xff]  ;;  %v148_v39 = vxor.u32 2147483648, %v226_v36 }
   0xa   :  { %215 = vst [vmem:[%s393_s1 + $0x30] sm:$0xff] %v100_v27  ;;  %217 = vst [vmem:[%s393_s1 + $0x90] sm:$0xff] %v108_v28  ;;  %v156_v40 = vxor.u32 2147483648, %v228_v37  ;;  %v164_v41 = vxor.u32 2147483648, %v230_v38  ;;  %v232_v42 = vld [vmem:[%s392_s0 + $0xb0] sm:$0xff]  ;;  %v234_v43 = vld [vmem:[%s392_s0 + $0x58] sm:$0xff] }
   0xb   :  { %219 = vst [vmem:[%s393_s1 + $0x38] sm:$0xff] %v116_v29  ;;  %v236_v44 = vld [vmem:[%s392_s0 + $0xb8] sm:$0xff]  ;;  %221 = vst [vmem:[%s393_s1 + $0x98] sm:$0xff] %v124_v33  ;;  %v172_v45 = vxor.u32 2147483648, %v232_v42  ;;  %v180_v46 = vxor.u32 2147483648, %v234_v43 }
   0xc   :  { %223 = vst [vmem:[%s393_s1 + $0x40] sm:$0xff] %v132_v34  ;;  %225 = vst [vmem:[%s393_s1 + $0xa0] sm:$0xff] %v140_v35  ;;  %v188_v47 = vxor.u32 2147483648, %v236_v44 }
   0xd   :  { %227 = vst [vmem:[%s393_s1 + $0x48] sm:$0xff] %v148_v39  ;;  %229 = vst [vmem:[%s393_s1 + $0xa8] sm:$0xff] %v156_v40 }
   0xe   :  { %231 = vst [vmem:[%s393_s1 + $0x50] sm:$0xff] %v164_v41  ;;  %233 = vst [vmem:[%s393_s1 + $0xb0] sm:$0xff] %v172_v45 }
   0xf   :  { %235 = vst [vmem:[%s393_s1 + $0x58] sm:$0xff] %v180_v46  ;;  %237 = vst [vmem:[%s393_s1 + $0xb8] sm:$0xff] %v188_v47 }

// kernel: _ce_and_lovasz_2d.2
= control target key start
LH: loop header
LB: loop body
LE: loop exit
PB: predicated region body
PF: predicated region fallthrough
CT: control target
= control target key end

     0   :  { %s988_s15 = smov 0   ;;  %s990_s16 = smov 0   ;;  %s1348_s0 = inlined_call_operand.vmem [shape: f32[16,1536], index: 0, kind: input, shape index: {}]   ;;  %s1349_s1 = inlined_call_operand.vmem [shape: s32[1,1536], index: 1, kind: input, shape index: {}]   ;;  %s1350_s2 = inlined_call_operand.vmem [shape: f32[16,1536], index: 2, kind: output, shape index: {0}]   ;;  %s1351_s3 = inlined_call_operand.vmem [shape: f32[16,1536], index: 3, kind: output, shape index: {1}]   ;;  %s1352_s4 = inlined_call_operand.vmem [shape: f32[16,384], index: 4, kind: output, shape index: {2}]  }
   0x1   :  { %s992_s17 = smov 0  }
   0x2 LB: > { %s1004_s18 = sadd.s32 4294967295, %s960_s17   ;;  %s1007_s19 = sadd.s32 1, %s960_s17   ;;  %s960_s17 = sphi %s992_s17, %s1356_s17   ;;  %s956_s16 = sphi %s990_s16, %s1355_s16   ;;  %s952_s15 = sphi %s988_s15, %s1354_s15  }
   0x3   : > { %s19_s20 = ssub.s32 %s960_s17, %s1007_s19  ;;  %s22_s21 = sadd.s32 1, %s956_s16 }
   0x4   : > { %p20_p0 = scmp.eq.s32.totalorder %s19_s20, 0  ;;  %p29_p1 = scmp.ne.s32.totalorder %s956_s16, %s952_s15 }
   0x5   : > { %p30_p2 = scmp.eq.s32.totalorder %s960_s17, 0  ;;  %p85_p3 = scmp.eq.s32.totalorder %s1004_s18, 2 }
   0x6   : > { %s1017_s22 = scalar_select %p20_p0, %s956_s16, %s22_s21  }
   0x7   : > { %p31_p4 = por %p30_p2, %p29_p1  ;;  %p1019_p5 = por %p85_p3, %p29_p1 }
   0x8   : > { %p845_p6 = scmp.ge.s32.totalorder %s960_s17, 3 }
   0xa   : > { %159 = sbr.rel (%p845_p6) target bundleno = 23 (0x17), region = 16 }
   0xf   : > { %162 = sbr.rel (!%p31_p4) target bundleno = 23 (0x17), region = 20  ;;  %s164_s24 = sand.u32 (%p31_p4), 1, %s956_s16  }
  0x10   : > { %s874_s25 = sshll.u32 (%p31_p4), %s960_s17, 5  ;;  %s846_s26 = sshll.u32 (%p31_p4), %s164_s24, 6 }
  0x11   : > { %s169_s29 = scalar_lea.vmem (%p31_p4), %s1348_s0, %s874_s25  ;;  %s166_s30 = scalar_lea.vmem (%p31_p4), [#allocation2], %s846_s26 }
  0x12   : > { %v182_v0 = vld [vmem:[%s169_s29] sm:$0xff] (%p31_p4)  ;;  %v184_v1 = vld [vmem:[%s169_s29 + $0x8] sm:$0xff] (%p31_p4)  ;;  %v186_v2 = vld [vmem:[%s169_s29 + $0x10] sm:$0xff] (%p31_p4) }
  0x13   : > { %183 = vst [vmem:[%s166_s30] sm:$0xff] (%p31_p4), %v182_v0  ;;  %185 = vst [vmem:[%s166_s30 + $0x8] sm:$0xff] (%p31_p4), %v184_v1  ;;  %v188_v3 = vld [vmem:[%s169_s29 + $0x18] sm:$0xff] (%p31_p4)  ;;  %v190_v4 = vld [vmem:[%s169_s29 + $0x60] sm:$0xff] (%p31_p4) }
  0x14   : > { %187 = vst [vmem:[%s166_s30 + $0x10] sm:$0xff] %v186_v2  ;;  %v192_v5 = vld [vmem:[%s169_s29 + $0x68] sm:$0xff]  ;;  %189 = vst [vmem:[%s166_s30 + $0x18] sm:$0xff] %v188_v3  ;;  %v194_v6 = vld [vmem:[%s169_s29 + $0x70] sm:$0xff] }
  0x15   : > { %191 = vst [vmem:[%s166_s30 + $0x20] sm:$0xff] %v190_v4  ;;  %193 = vst [vmem:[%s166_s30 + $0x28] sm:$0xff] %v192_v5  ;;  %v196_v7 = vld [vmem:[%s169_s29 + $0x78] sm:$0xff] }
  0x16   : > { %195 = vst [vmem:[%s166_s30 + $0x30] sm:$0xff] %v194_v6  ;;  %197 = vst [vmem:[%s166_s30 + $0x38] sm:$0xff] %v196_v7 }
  0x17 PF: > { %p849_p7 = scmp.ge.s32.totalorder %s960_s17, 1  ;;  %p210_p8 = scmp.lt.s32.totalorder %s960_s17, 4 }
  0x19   : > { %p211_p9 = pnand %p849_p7, %p210_p8 }
  0x1a   : > { %s217_s5 = sand.u32 (!%p211_p9), 1, %s952_s15   ;;  %s854_s6 = sshll.u32 (!%p211_p9), %s1004_s18, 2 }
  0x1b   : > { %214 = sbr.rel (%p211_p9) target bundleno = 351 (0x15f), region = 47  ;;  %s1035_s7 = sshll.u32 (!%p211_p9), %s217_s5, 6 }
  0x1c   : > { %p255_p10 = scmp.lt.s32.totalorder (!%p211_p9), %s854_s6, 11  ;;  %s219_s8 = scalar_lea.vmem (!%p211_p9), [#allocation2], %s1035_s7 }
  0x1d   : > { %s1156_s12 = scalar_lea.vmem (!%p211_p9), [#allocation4], %s1035_s7  ;;  %s1259_s13 = scalar_lea.vmem (!%p211_p9), [#allocation3], %s1035_s7 }
  0x1e   : > { %s853_s17 = sshll.u32 (!%p211_p9), %s217_s5, 4 }
  0x1f   : > { %s1298_s21 = scalar_lea.vmem (!%p211_p9), [#allocation5], %s853_s17 }
  0x20   : > { %v378_v8 = vlaneseq  ;;  %s1358_s6 = smov (!%p255_p10, %s854_s6), 11  ;;  %v261_v10 = vld [vmem:[%s219_s8] sm:$0xff]  ;;  %v262_v11 = vld [vmem:[%s219_s8 + $0x8] sm:$0xff]  ;;  %v263_v12 = vld [vmem:[%s219_s8 + $0x10] sm:$0xff]  ;;  %v962_v54 = vmov 0.0   ;;  %vm537_vm9 = vcmask 1040384  }
  0x21   : > { %v264_v13 = vld [vmem:[%s219_s8 + $0x18] sm:$0xff]  ;;  %v265_v14 = vld [vmem:[%s219_s8 + $0x20] sm:$0xff]  ;;  %v266_v15 = vld [vmem:[%s219_s8 + $0x28] sm:$0xff]  ;;  %s257_s11 = scalar_lea.vmem %s1349_s1, %s1358_s6  ;;  %s875_s15 = sshll.u32 (%p1019_p5), %s1004_s18, 5 }
  0x22   : > { %v1038_v9 = vshrl.u32 %v378_v8, 7  ;;  %v267_v16 = vld [vmem:[%s219_s8 + $0x30] sm:$0xff]  ;;  %v1044_v17 = vld [vmem:[%s219_s8 + $0x38] sm:$0xff]  ;;  %v269_v18 = vmax.f32 %v261_v10, %v265_v14  ;;  %v276_v19 = vmax.f32 %v262_v11, %v266_v15  ;;  %v377_v24 = vld [vmem:[%s257_s11] sm:$0xf]  ;;  %s610_s26 = scalar_lea.vmem (%p1019_p5), %s1350_s2, %s875_s15 }
  0x23   : > { %v283_v22 = vmax.f32 %v263_v12, %v267_v16  ;;  %v290_v23 = vmax.f32 %v264_v13, %v1044_v17  ;;  %vm421_vm8 = vcmp.ne.s32.totalorder %v377_v24, 0 }
  0x24   : > { %v383_v20 = vsub.s32 0, %v1038_v9  ;;  %v387_v21 = vsub.s32 1, %v1038_v9  ;;  %v391_v25 = vsub.s32 2, %v1038_v9  ;;  %v395_v26 = vsub.s32 3, %v1038_v9 }
  0x25   : > { %v270_v27 = vrot.slane %v269_v18, 4  ;;  %v277_v28 = vrot.slane %v276_v19, 4  ;;  %v284_v29 = vrot.slane %v283_v22, 4  ;;  %v291_v30 = vrot.slane %v290_v23, 4 }
  0x26   : > { %v384_v33 = vrot.slane %v377_v24, %v383_v20  ;;  %v388_v34 = vrot.slane %v377_v24, %v387_v21  ;;  %v392_v37 = vrot.slane %v377_v24, %v391_v25  ;;  %v1059_v38 = vrot.slane %v377_v24, %v395_v26 }
  0x27   : > { %v271_v31 = vmax.f32 %v269_v18, %v270_v27  ;;  %v278_v32 = vmax.f32 %v276_v19, %v277_v28  ;;  %v285_v35 = vmax.f32 %v283_v22, %v284_v29  ;;  %v292_v36 = vmax.f32 %v290_v23, %v291_v30 }
  0x28   : > { %v380_v41 = vadd.s32 8, %v1038_v9  ;;  %vm397_vm0 = vcmp.eq.s32.totalorder %v1038_v9, %v384_v33  ;;  %vm398_vm1 = vcmp.eq.s32.totalorder %v1038_v9, %v388_v34  ;;  %vm399_vm2 = vcmp.eq.s32.totalorder %v1038_v9, %v392_v37 }
  0x29   : > { %v272_v39 = vrot.slane %v271_v31, 2  ;;  %v279_v40 = vrot.slane %v278_v32, 2  ;;  %v286_v42 = vrot.slane %v285_v35, 2  ;;  %v293_v43 = vrot.slane %v292_v36, 2 }
  0x2a   : > { %vm400_vm3 = vcmp.eq.s32.totalorder %v1038_v9, %v1059_v38  ;;  %vm401_vm4 = vcmp.eq.s32.totalorder %v380_v41, %v384_v33  ;;  %vm402_vm5 = vcmp.eq.s32.totalorder %v380_v41, %v388_v34  ;;  %vm403_vm6 = vcmp.eq.s32.totalorder %v380_v41, %v392_v37 }
  0x2b   : > { %v273_v44 = vmax.f32 %v271_v31, %v272_v39  ;;  %v280_v45 = vmax.f32 %v278_v32, %v279_v40  ;;  %v287_v46 = vmax.f32 %v285_v35, %v286_v42  ;;  %v294_v47 = vmax.f32 %v292_v36, %v293_v43 }
  0x2c   : > { %vm404_vm7 = vcmp.eq.s32.totalorder %v380_v41, %v1059_v38  ;;  %v1070_v55 = vsel %vm397_vm0, 1.0, %v962_v54  ;;  %v1074_v58 = vsel %vm398_vm1, 1.0, %v962_v54  ;;  %v1078_v59 = vsel %vm399_vm2, 1.0, %v962_v54 }
  0x2d   : > { %v274_v48 = vrot.slane %v273_v44, 1  ;;  %v281_v49 = vrot.slane %v280_v45, 1  ;;  %v288_v50 = vrot.slane %v287_v46, 1  ;;  %v295_v51 = vrot.slane %v294_v47, 1 }
  0x2e   : > { %v1089_v63 = vsel %vm400_vm3, 1.0, %v962_v54  ;;  %v863_v3 = vsel %vm421_vm8, 1.0, %v962_v54  ;;  %v1102_v7 = vsel %vm401_vm4, 1.0, %v962_v54  ;;  %v1149_v9 = vsel %vm404_vm7, 1.0, %v962_v54 }
  0x2f   : > { %v275_v52 = vmax.f32 %v273_v44, %v274_v48  ;;  %v282_v53 = vmax.f32 %v280_v45, %v281_v49  ;;  %v289_v56 = vmax.f32 %v287_v46, %v288_v50  ;;  %v296_v57 = vmax.f32 %v294_v47, %v295_v51 }
  0x30   : > { %v1123_v18 = vrot.slane %v863_v3, %v387_v21  ;;  %v1127_v19 = vrot.slane %v863_v3, %v391_v25  ;;  %v1132_v23 = vrot.slane %v863_v3, %v395_v26 }
  0x31   : > { %v1080_v60 = vsub.f32 %v261_v10, %v275_v52  ;;  %v1082_v61 = vsub.f32 %v262_v11, %v282_v53  ;;  %v1084_v62 = vsub.f32 %v265_v14, %v275_v52  ;;  %v1091_v0 = vsub.f32 %v263_v12, %v289_v56 }
  0x32   : > { %v1093_v1 = vsub.f32 %v264_v13, %v296_v57  ;;  %v1095_v2 = vsub.f32 %v266_v15, %v282_v53  ;;  %v1097_v4 = vsub.f32 %v267_v16, %v289_v56  ;;  %v1105_v10 = vsub.f32 %v1044_v17, %v296_v57 }
  0x33   : > { %v305_v5 = vmul.f32 1.442695, %v1080_v60  ;;  %v307_v6 = vmul.f32 1.442695, %v1082_v61  ;;  %v309_v11 = vmul.f32 1.442695, %v1091_v0  ;;  %v1118_v16 = vrot.slane %v863_v3, %v383_v20 }
  0x34   : > { %v311_v12 = vmul.f32 1.442695, %v1093_v1  ;;  %v1110_v13 = vsel %vm402_vm5, 1.0, %v962_v54  ;;  %v313_v14 = vmul.f32 1.442695, %v1084_v62  ;;  %v1114_v15 = vsel %vm403_vm6, 1.0, %v962_v54 }
  0x35   : > { %906 = vpow2.f32 %v305_v5  ;;  %v315_v17 = vmul.f32 1.442695, %v1095_v2  ;;  %v317_v22 = vmul.f32 1.442695, %v1097_v4  ;;  %v1136_v20 = vmul.f32 %v1070_v55, %v1118_v16 }
  0x36   : > { %908 = vpow2.f32 %v307_v6  ;;  %v319_v24 = vmul.f32 1.442695, %v1105_v10  ;;  %v1141_v21 = vmul.f32 %v1074_v58, %v1123_v18  ;;  %v1145_v25 = vmul.f32 %v1078_v59, %v1127_v19 }
  0x37   : > { %910 = vpow2.f32 %v309_v11  ;;  %v1153_v26 = vmul.f32 %v1089_v63, %v1132_v23  ;;  %485 = vst [vmem:[%s1156_s12] sm:$0xff] %v1136_v20  ;;  %v1162_v27 = vmul.f32 %v1102_v7, %v1118_v16  ;;  %v1172_v29 = vmul.f32 %v1110_v13, %v1123_v18 }
  0x38   : > { %912 = vpow2.f32 %v311_v12  ;;  %v570_v28 = vadd.f32 %v1141_v21, %v1136_v20  ;;  %486 = vst [vmem:[%s1156_s12 + $0x8] sm:$0xff] %v1141_v21  ;;  %487 = vst [vmem:[%s1156_s12 + $0x10] sm:$0xff] %v1145_v25  ;;  %v1176_v30 = vmul.f32 %v1114_v15, %v1127_v19  ;;  %v1182_v31 = vmul.f32 %v1149_v9, %v1132_v23 }
  0x39   : > { %914 = vpow2.f32 %v313_v14  ;;  %488 = vst [vmem:[%s1156_s12 + $0x18] sm:$0xff] %v1153_v26  ;;  %489 = vst [vmem:[%s1156_s12 + $0x20] sm:$0xff] %v1162_v27  ;;  %v575_v33 = vadd.f32 %v1172_v29, %v1162_v27 }
  0x3a   : > { %916 = vpow2.f32 %v315_v17  ;;  %v571_v32 = vadd.f32 %v570_v28, %v1145_v25  ;;  %490 = vst [vmem:[%s1156_s12 + $0x28] sm:$0xff] %v1172_v29  ;;  %491 = vst [vmem:[%s1156_s12 + $0x30] sm:$0xff] %v1176_v30 }
  0x3b   : > { %918 = vpow2.f32 %v317_v22  ;;  %492 = vst [vmem:[%s1156_s12 + $0x38] sm:$0xff] %v1182_v31  ;;  %v576_v35 = vadd.f32 %v575_v33, %v1176_v30 }
  0x3c   : > { %920 = vpow2.f32 %v319_v24  ;;  %v572_v34 = vadd.f32 %v571_v32, %v1153_v26 }
  0x3d   : > { %v577_v36 = vadd.f32 %v576_v35, %v1182_v31 }
  0x3e   : > { %573 = vadd.xlane.f32.xlu1 %v572_v34 }
  0x42   : > { %v1198_v37 = vpop.eup %906  ;;  %578 = vadd.xlane.f32.xlu1 %v577_v36 }
  0x43   : > { %v1200_v38 = vpop.eup %908 }
  0x44   : > { %v1202_v39 = vpop.eup %910 }
  0x45   : > { %v1204_v40 = vpop.eup %912 }
  0x46   : > { %v1206_v41 = vpop.eup %914 }
  0x47   : > { %v1208_v42 = vpop.eup %916  ;;  %v321_v43 = vadd.f32 %v1206_v41, %v1198_v37 }
  0x48   : > { %v1212_v44 = vpop.eup %918  ;;  %v328_v45 = vadd.f32 %v1208_v42, %v1200_v38 }
  0x49   : > { %v1216_v46 = vpop.eup %920  ;;  %v322_v47 = vrot.slane %v321_v43, 4  ;;  %v335_v48 = vadd.f32 %v1212_v44, %v1202_v39 }
  0x4a   : > { %v329_v49 = vrot.slane %v328_v45, 4  ;;  %v342_v50 = vadd.f32 %v1216_v46, %v1204_v40 }
  0x4b   : > { %v323_v51 = vadd.f32 %v322_v47, %v321_v43  ;;  %v336_v52 = vrot.slane %v335_v48, 4 }
  0x4c   : > { %v330_v53 = vadd.f32 %v329_v49, %v328_v45  ;;  %v343_v54 = vrot.slane %v342_v50, 4 }
  0x4d   : > { %v324_v56 = vrot.slane %v323_v51, 2  ;;  %v337_v57 = vadd.f32 %v336_v52, %v335_v48 }
  0x4e   : > { %v331_v3 = vrot.slane %v330_v53, 2  ;;  %v344_v5 = vadd.f32 %v343_v54, %v342_v50 }
  0x4f   : > { %v325_v6 = vadd.f32 %v324_v56, %v323_v51  ;;  %v338_v11 = vrot.slane %v337_v57, 2  ;;  %v1226_v56 = vsel %vm537_vm9, %v1118_v16, 0.0 }
  0x50   : > { %v332_v12 = vadd.f32 %v331_v3, %v330_v53  ;;  %v345_v14 = vrot.slane %v344_v5, 2 }
  0x51   : > { %v326_v17 = vrot.slane %v325_v6, 1  ;;  %v339_v22 = vadd.f32 %v338_v11, %v337_v57  ;;  %v1232_v11 = vsel %vm537_vm9, %v1123_v18, 0.0 }
  0x52   : > { %v333_v24 = vrot.slane %v332_v12, 1  ;;  %v346_v28 = vadd.f32 %v345_v14, %v344_v5 }
  0x53   : > { %v327_v32 = vadd.f32 %v326_v17, %v325_v6  ;;  %v340_v33 = vrot.slane %v339_v22, 1 }
  0x54   : > { %v334_v34 = vadd.f32 %v333_v24, %v332_v12  ;;  %v347_v35 = vrot.slane %v346_v28, 1 }
  0x55   : > { %v341_v36 = vadd.f32 %v340_v33, %v339_v22  ;;  %922 = vlog2.f32 %v327_v32 }
  0x56   : > { %v348_v43 = vadd.f32 %v347_v35, %v346_v28  ;;  %924 = vlog2.f32 %v334_v34 }
  0x57   : > { %926 = vlog2.f32 %v341_v36 }
  0x58   : > { %928 = vlog2.f32 %v348_v43 }
  0x59   : > { %930 = vrcp.f32 %v327_v32 }
  0x5a   : > { %932 = vrcp.f32 %v334_v34 }
  0x5b   : > { %934 = vrcp.f32 %v341_v36 }
  0x5c   : > { %936 = vrcp.f32 %v348_v43 }
  0x62   : > { %v923_v45 = vpop.eup %922 }
  0x63   : > { %v925_v47 = vpop.eup %924  ;;  %v362_v48 = vmul.f32 0.6931472, %v923_v45 }
  0x64   : > { %v927_v49 = vpop.eup %926  ;;  %v364_v50 = vmul.f32 0.6931472, %v925_v47 }
  0x65   : > { %v929_v51 = vpop.eup %928  ;;  %v366_v52 = vmul.f32 0.6931472, %v927_v49  ;;  %v369_v53 = vsub.f32 %v1080_v60, %v362_v48  ;;  %v373_v54 = vsub.f32 %v1084_v62, %v362_v48 }
  0x66   : > { %v931_v57 = vpop.eup %930  ;;  %v368_v3 = vmul.f32 0.6931472, %v929_v51  ;;  %v370_v5 = vsub.f32 %v1082_v61, %v364_v50  ;;  %v374_v6 = vsub.f32 %v1095_v2, %v364_v50 }
  0x67   : > { %v933_v12 = vpop.eup %932  ;;  %v371_v14 = vsub.f32 %v1091_v0, %v366_v52  ;;  %v375_v60 = vsub.f32 %v1097_v4, %v366_v52  ;;  %v493_v62 = vmul.f32 %v1070_v55, %v369_v53  ;;  %v497_v17 = vmul.f32 %v1102_v7, %v373_v54 }
  0x68   : > { %v935_v22 = vpop.eup %934  ;;  %v372_v24 = vsub.f32 %v1093_v1, %v368_v3  ;;  %v376_v61 = vsub.f32 %v1105_v10, %v368_v3  ;;  %v494_v2 = vmul.f32 %v1074_v58, %v370_v5  ;;  %v498_v28 = vmul.f32 %v1110_v13, %v374_v6 }
  0x69   : > { %v937_v32 = vpop.eup %936  ;;  %v495_v33 = vmul.f32 %v1078_v59, %v371_v14  ;;  %v499_v0 = vmul.f32 %v1114_v15, %v375_v60  ;;  %v501_v34 = vadd.f32 %v497_v17, %v493_v62  ;;  %v350_v4 = vmul.f32 %v931_v57, %v1198_v37 }
  0x6a   : > { %v496_v55 = vmul.f32 %v1089_v63, %v372_v24  ;;  %v500_v7 = vmul.f32 %v1149_v9, %v376_v61  ;;  %v508_v35 = vadd.f32 %v498_v28, %v494_v2  ;;  %v352_v1 = vmul.f32 %v933_v12, %v1200_v38 }
  0x6b   : > { %v502_v10 = vrot.slane %v501_v34, 4  ;;  %v515_v36 = vadd.f32 %v499_v0, %v495_v33  ;;  %v354_v58 = vmul.f32 %v935_v22, %v1202_v39  ;;  %v356_v13 = vmul.f32 %v937_v32, %v1204_v40 }
  0x6c   : > { %v509_v43 = vrot.slane %v508_v35, 4  ;;  %v522_v59 = vadd.f32 %v500_v7, %v496_v55  ;;  %v453_v15 = vsub.f32 %v1136_v20, %v350_v4  ;;  %v454_v45 = vsub.f32 %v1141_v21, %v352_v1 }
  0x6d   : > { %v503_v37 = vadd.f32 %v502_v10, %v501_v34  ;;  %v516_v47 = vrot.slane %v515_v36, 4  ;;  %v455_v63 = vsub.f32 %v1145_v25, %v354_v58  ;;  %v456_v9 = vsub.f32 %v1153_v26, %v356_v13 }
  0x6e   : > { %v510_v48 = vadd.f32 %v509_v43, %v508_v35  ;;  %v523_v38 = vrot.slane %v522_v59, 4  ;;  %v461_v49 = vand.u32 2147483647, %v453_v15  ;;  %v462_v50 = vand.u32 2147483647, %v454_v45 }
  0x6f   : > { %v504_v39 = vrot.slane %v503_v37, 2  ;;  %v517_v51 = vadd.f32 %v516_v47, %v515_v36  ;;  %v463_v40 = vand.u32 2147483647, %v455_v63  ;;  %v464_v52 = vand.u32 2147483647, %v456_v9 }
  0x70   : > { %v511_v53 = vrot.slane %v510_v48, 2  ;;  %v524_v54 = vadd.f32 %v523_v38, %v522_v59  ;;  %v469_v20 = vmul.f32 %v461_v49, %v1118_v16  ;;  %v470_v21 = vmul.f32 %v462_v50, %v1123_v18 }
  0x71   : > { %v505_v3 = vadd.f32 %v504_v39, %v503_v37  ;;  %v518_v5 = vrot.slane %v517_v51, 2  ;;  %v471_v25 = vmul.f32 %v463_v40, %v1127_v19  ;;  %v472_v26 = vmul.f32 %v464_v52, %v1132_v23 }
  0x72   : > { %v512_v6 = vadd.f32 %v511_v53, %v510_v48  ;;  %v525_v14 = vrot.slane %v524_v54, 2  ;;  %477 = vst [vmem:[%s1259_s13] sm:$0xff] %v469_v20  ;;  %478 = vst [vmem:[%s1259_s13 + $0x8] sm:$0xff] %v470_v21  ;;  %v357_v60 = vmul.f32 %v931_v57, %v1206_v41  ;;  %v358_v62 = vmul.f32 %v933_v12, %v1208_v42 }
  0x73   : > { %v506_v17 = vrot.slane %v505_v3, 1  ;;  %v519_v24 = vadd.f32 %v518_v5, %v517_v51  ;;  %479 = vst [vmem:[%s1259_s13 + $0x10] sm:$0xff] %v471_v25  ;;  %480 = vst [vmem:[%s1259_s13 + $0x18] sm:$0xff] %v472_v26  ;;  %v359_v61 = vmul.f32 %v935_v22, %v1212_v44  ;;  %v360_v2 = vmul.f32 %v937_v32, %v1216_v46 }
  0x74   : > { %v513_v28 = vrot.slane %v512_v6, 1  ;;  %v526_v33 = vadd.f32 %v525_v14, %v524_v54  ;;  %v457_v0 = vsub.f32 %v1162_v27, %v357_v60  ;;  %v458_v34 = vsub.f32 %v1172_v29, %v358_v62 }
  0x75   : > { %v507_v4 = vadd.f32 %v506_v17, %v505_v3  ;;  %v520_v55 = vrot.slane %v519_v24, 1  ;;  %v459_v41 = vsub.f32 %v1176_v30, %v359_v61  ;;  %v460_v42 = vsub.f32 %v1182_v31, %v360_v2 }
  0x76   : > { %v514_v57 = vadd.f32 %v513_v28, %v512_v6  ;;  %v527_v12 = vrot.slane %v526_v33, 1  ;;  %v465_v7 = vand.u32 2147483647, %v457_v0  ;;  %v466_v35 = vand.u32 2147483647, %v458_v34 }
  0x77   : > { %v521_v44 = vadd.f32 %v520_v55, %v519_v24  ;;  %v529_v46 = vsub.f32 0.0, %v507_v4  ;;  %v467_v22 = vand.u32 2147483647, %v459_v41  ;;  %v468_v32 = vand.u32 2147483647, %v460_v42 }
  0x78   : > { %v528_v27 = vadd.f32 %v527_v12, %v526_v33  ;;  %v530_v29 = vsub.f32 0.0, %v514_v57  ;;  %v473_v1 = vmul.f32 %v465_v7, %v1118_v16  ;;  %v474_v30 = vmul.f32 %v466_v35, %v1123_v18 }
  0x79   : > { %v531_v10 = vsub.f32 0.0, %v521_v44  ;;  %v533_v31 = vmul.f32 %v529_v46, %v1118_v16  ;;  %v475_v36 = vmul.f32 %v467_v22, %v1127_v19  ;;  %v476_v58 = vmul.f32 %v468_v32, %v1132_v23  ;;  %v625_v28 = vld [vmem:[%s1259_s13 + $0x8] sm:$0xff] (%p1019_p5) }
  0x7a   : > { %v532_v13 = vsub.f32 0.0, %v528_v27  ;;  %v534_v43 = vmul.f32 %v530_v29, %v1123_v18  ;;  %481 = vst [vmem:[%s1259_s13 + $0x20] sm:$0xff] %v473_v1  ;;  %482 = vst [vmem:[%s1259_s13 + $0x28] sm:$0xff] %v474_v30  ;;  %v556_v45 = vadd.f32 %v1232_v11, %v1226_v56  ;;  %v557_v47 = vsel %vm537_vm9, %v1127_v19, 0.0  ;;  %v627_v33 = vld [vmem:[%s1259_s13 + $0x10] sm:$0xff] (%p1019_p5)  ;;  %v629_v0 = vld [vmem:[%s1259_s13 + $0x18] sm:$0xff] (%p1019_p5) }
  0x7b   : > { %v535_v59 = vmul.f32 %v531_v10, %v1127_v19  ;;  %v538_v15 = vsel %vm537_vm9, %v533_v31, 0.0  ;;  %483 = vst [vmem:[%s1259_s13 + $0x30] sm:$0xff] %v475_v36  ;;  %484 = vst [vmem:[%s1259_s13 + $0x38] sm:$0xff] %v476_v58  ;;  %v559_v49 = vsel %vm537_vm9, %v1132_v23, 0.0  ;;  %v581_v6 = vand.u32 127, %v378_v8  ;;  %v623_v8 = vld [vmem:[%s1259_s13] sm:$0xff] (%p1019_p5) }
  0x7c   : > { %v536_v16 = vmul.f32 %v532_v13, %v1132_v23  ;;  %v539_v37 = vsel %vm537_vm9, %v534_v43, 0.0  ;;  %v558_v38 = vadd.f32 %v557_v47, %v556_v45  ;;  %624 = vst [vmem:[%s610_s26] sm:$0xff] (%p1019_p5), %v623_v8  ;;  %626 = vst [vmem:[%s610_s26 + $0x8] sm:$0xff] (%p1019_p5), %v625_v28 }
  0x7d   : > { %v540_v63 = vadd.f32 %v539_v37, %v538_v15  ;;  %v541_v18 = vsel %vm537_vm9, %v535_v59, 0.0  ;;  %vm584_vm10 = vcmp.eq.s32.totalorder %v581_v6, 2  ;;  %vm583_vm11 = vcmp.eq.s32.totalorder %v581_v6, 1  ;;  %628 = vst [vmem:[%s610_s26 + $0x10] sm:$0xff] (%p1019_p5), %v627_v33  ;;  %630 = vst [vmem:[%s610_s26 + $0x18] sm:$0xff] (%p1019_p5), %v629_v0 }
  0x7e   : > { %v543_v9 = vsel %vm537_vm9, %v536_v16, 0.0  ;;  %v560_v11 = vadd.f32 %v559_v49, %v558_v38  ;;  %vm582_vm12 = vcmp.eq.s32.totalorder %v581_v6, 0 }
  0x7f   : > { %v542_v48 = vadd.f32 %v541_v18, %v540_v63 }
  0x81   : > { %v544_v56 = vadd.f32 %v543_v9, %v542_v48  ;;  %v631_v34 = vld [vmem:[%s1259_s13 + $0x20] sm:$0xff] (%p1019_p5)  ;;  %v633_v4 = vld [vmem:[%s1259_s13 + $0x28] sm:$0xff] (%p1019_p5) }
  0x82   : > { %632 = vst [vmem:[%s610_s26 + $0x60] sm:$0xff] (%p1019_p5), %v631_v34  ;;  %634 = vst [vmem:[%s610_s26 + $0x68] sm:$0xff] (%p1019_p5), %v633_v4  ;;  %v635_v55 = vld [vmem:[%s1259_s13 + $0x30] sm:$0xff] (%p1019_p5)  ;;  %v637_v41 = vld [vmem:[%s1259_s13 + $0x38] sm:$0xff] (%p1019_p5) }
  0x83   : > { %545 = vadd.xlane.f32.xlu0 %v544_v56  ;;  %636 = vst [vmem:[%s610_s26 + $0x70] sm:$0xff] (%p1019_p5), %v635_v55  ;;  %638 = vst [vmem:[%s610_s26 + $0x78] sm:$0xff] (%p1019_p5), %v637_v41 }
  0x87   : > { %561 = vadd.xlane.f32.xlu0 %v560_v11 }
  0xc7   : > { %v574_v26 = vpop.xlane.xlu1 %573 }
  0xcb   : > { %v579_v60 = vpop.xlane.xlu1 %578 }
 0x10c   : > { %v546_v50 = vpop.xlane.xlu0 %545 }
 0x10d   : > { %v547_v39 = vrot.slane %v546_v50, 4 }
 0x10f   : > { %v548_v51 = vadd.f32 %v547_v39, %v546_v50 }
 0x110   : > { %v562_v40 = vpop.xlane.xlu0 %561 }
 0x111   : > { %v549_v52 = vrot.slane %v548_v51, 2  ;;  %v563_v19 = vrot.slane %v562_v40, 4 }
 0x113   : > { %v564_v53 = vadd.f32 %v563_v19, %v562_v40  ;;  %v550_v54 = vadd.f32 %v549_v52, %v548_v51 }
 0x115   : > { %v565_v20 = vrot.slane %v564_v53, 2  ;;  %v551_v21 = vrot.slane %v550_v54, 1 }
 0x117   : > { %v566_v3 = vadd.f32 %v565_v20, %v564_v53  ;;  %v552_v5 = vadd.f32 %v551_v21, %v550_v54 }
 0x119   : > { %877 = vpush %v552_v5  ;;  %v567_v25 = vrot.slane %v566_v3, 1 }
 0x11b   : > { %v568_v23 = vadd.f32 %v567_v25, %v566_v3 }
 0x11d   : > { %879 = vpush %v568_v23 }
 0x14a   : > { %s878_s14 = spop %877 }
 0x14b   : > { %v587_v62 = vstv %s878_s14 }
 0x14e   : > { %s880_s20 = spop %879 }
 0x14f   : > { %v585_v14 = vstv %s880_s20  ;;  %607 = sbr.rel (!%p1019_p5) target bundleno = 340 (0x154), region = 55 }
 0x150   : > { %v586_v17 = vsel %vm584_vm10, %v585_v14, 0.0 }
 0x151   : > { %v588_v24 = vsel %vm583_vm11, %v587_v62, %v586_v17 }
 0x152   : > { %v589_v61 = vsel %vm582_vm12, %v574_v26, %v588_v24  ;;  %v590_v2 = vsel %vm582_vm12, %v579_v60, %v588_v24 }
 0x153   : > { %591 = vst [vmem:[%s1298_s21] sm:$0xff] %v589_v61  ;;  %592 = vst [vmem:[%s1298_s21 + $0x8] sm:$0xff] %v590_v2 }
 0x154 PF: > { %644 = sbr.rel (!%p1019_p5) target bundleno = 346 (0x15a), region = 78  ;;  %s876_s27 = sshll.u32 (%p1019_p5), %s1004_s18, 5  ;;  %v660_v42 = vld [vmem:[%s1156_s12] sm:$0xff] (%p1019_p5)  ;;  %v662_v57 = vld [vmem:[%s1156_s12 + $0x8] sm:$0xff] (%p1019_p5)  ;;  %v664_v12 = vld [vmem:[%s1156_s12 + $0x10] sm:$0xff] (%p1019_p5) }
 0x155   : > { %s647_s30 = scalar_lea.vmem (%p1019_p5), %s1351_s3, %s876_s27  ;;  %v666_v7 = vld [vmem:[%s1156_s12 + $0x18] sm:$0xff] (%p1019_p5)  ;;  %v668_v35 = vld [vmem:[%s1156_s12 + $0x20] sm:$0xff] (%p1019_p5)  ;;  %v670_v44 = vld [vmem:[%s1156_s12 + $0x28] sm:$0xff] (%p1019_p5) }
 0x156   : > { %661 = vst [vmem:[%s647_s30] sm:$0xff] (%p1019_p5), %v660_v42  ;;  %663 = vst [vmem:[%s647_s30 + $0x8] sm:$0xff] (%p1019_p5), %v662_v57  ;;  %v672_v46 = vld [vmem:[%s1156_s12 + $0x30] sm:$0xff] (%p1019_p5)  ;;  %v674_v22 = vld [vmem:[%s1156_s12 + $0x38] sm:$0xff] (%p1019_p5) }
 0x157   : > { %665 = vst [vmem:[%s647_s30 + $0x10] sm:$0xff] (%p1019_p5), %v664_v12  ;;  %667 = vst [vmem:[%s647_s30 + $0x18] sm:$0xff] (%p1019_p5), %v666_v7 }
 0x158   : > { %669 = vst [vmem:[%s647_s30 + $0x60] sm:$0xff] (%p1019_p5), %v668_v35  ;;  %671 = vst [vmem:[%s647_s30 + $0x68] sm:$0xff] (%p1019_p5), %v670_v44 }
 0x159   : > { %673 = vst [vmem:[%s647_s30 + $0x70] sm:$0xff] %v672_v46  ;;  %675 = vst [vmem:[%s647_s30 + $0x78] sm:$0xff] %v674_v22 }
 0x15a PF: > { %681 = sbr.rel (!%p1019_p5) target bundleno = 351 (0x15f), region = 101  ;;  %s871_s5 = sshll.u32 (%p1019_p5), %s1004_s18, 3 }
 0x15b   : > { %v714_v32 = vld [vmem:[%s1298_s21] sm:$0xff] (%p1019_p5)  ;;  %v716_v27 = vld [vmem:[%s1298_s21 + $0x8] sm:$0xff] (%p1019_p5)  ;;  %s683_s8 = scalar_lea.vmem (%p1019_p5), %s1352_s4, %s871_s5 }
 0x15c   : > { %715 = vst [vmem:[%s683_s8] sm:$0xff] (%p1019_p5), %v714_v32  ;;  %717 = vst [vmem:[%s683_s8 + $0x18] sm:$0xff] (%p1019_p5), %v716_v27 }
 0x15f PF: > { %p12_p11 = scmp.ge.s32.totalorder %s1007_s19, 5   ;;  %s1354_s15 = smov %s956_s16 }
 0x160   : > { %s1355_s16 = smov %s1017_s22  ;;  %s1356_s17 = smov %s1007_s19 }
 0x161   :  { %14 = sbr.rel (!%p12_p11) target bundleno = 2 (0x2), region = 197 }

// kernel: _ce_and_lovasz_2d.3
= control target key start
LH: loop header
LB: loop body
LE: loop exit
PB: predicated region body
PF: predicated region fallthrough
CT: control target
= control target key end

     0   :  { %s3811_s12 = smov 0   ;;  %s3813_s13 = smov 0   ;;  %s4443_s0 = inlined_call_operand.vmem [shape: f32[16,1], index: 0, kind: input, shape index: {}]   ;;  %s4444_s1 = inlined_call_operand.vmem [shape: f32[16,1536], index: 1, kind: input, shape index: {}]   ;;  %s4445_s2 = inlined_call_operand.vmem [shape: f32[16,1536], index: 2, kind: input, shape index: {}]   ;;  %s4446_s3 = inlined_call_operand.vmem [shape: f32[16,1], index: 3, kind: output, shape index: {}]  }
   0x1   :  { %s3815_s14 = smov 0  }
   0x2 LB: > { %s3231_s15 = sadd.s32 4294967295, %s3784_s14   ;;  %s3828_s16 = sadd.s32 1, %s3784_s14   ;;  %s3784_s14 = sphi %s3815_s14, %s4450_s14   ;;  %s3780_s13 = sphi %s3813_s13, %s4449_s13   ;;  %s3776_s12 = sphi %s3811_s12, %s4448_s12  }
   0x3   : > { %s38_s17 = ssub.s32 %s3784_s14, %s3828_s16  ;;  %s41_s18 = sadd.s32 1, %s3780_s13 }
   0x4   : > { %p39_p0 = scmp.eq.s32.totalorder %s38_s17, 0  ;;  %p48_p1 = scmp.ne.s32.totalorder %s3780_s13, %s3776_s12 }
   0x5   : > { %p49_p2 = scmp.eq.s32.totalorder %s3784_s14, 0  ;;  %p3233_p4 = scmp.ge.s32.totalorder %s3784_s14, 3 }
   0x6   : > { %s3837_s19 = scalar_select %p39_p0, %s3780_s13, %s41_s18  }
   0x7   : > { %p3839_p3 = por %p49_p2, %p48_p1  ;;  %124 = sbr.rel (%p3233_p4) target bundleno = 28 (0x1c), region = 20 }
   0xc   : > { %127 = sbr.rel (!%p3839_p3) target bundleno = 20 (0x14), region = 24  ;;  %s129_s21 = sand.u32 (%p3839_p3), 1, %s3780_s13  }
   0xd   : > { %s3571_s22 = sshll.u32 (%p3839_p3), %s3784_s14, 5  ;;  %s3234_s23 = sshll.u32 (%p3839_p3), %s129_s21, 6 }
   0xe   : > { %s134_s26 = scalar_lea.vmem (%p3839_p3), %s4444_s1, %s3571_s22  ;;  %s131_s27 = scalar_lea.vmem (%p3839_p3), [#allocation4], %s3234_s23 }
   0xf   : > { %v147_v0 = vld [vmem:[%s134_s26] sm:$0xff] (%p3839_p3)  ;;  %v149_v1 = vld [vmem:[%s134_s26 + $0x8] sm:$0xff] (%p3839_p3)  ;;  %v151_v2 = vld [vmem:[%s134_s26 + $0x10] sm:$0xff] (%p3839_p3) }
  0x10   : > { %148 = vst [vmem:[%s131_s27] sm:$0xff] (%p3839_p3), %v147_v0  ;;  %150 = vst [vmem:[%s131_s27 + $0x8] sm:$0xff] (%p3839_p3), %v149_v1  ;;  %v153_v3 = vld [vmem:[%s134_s26 + $0x18] sm:$0xff] (%p3839_p3)  ;;  %v155_v4 = vld [vmem:[%s134_s26 + $0x60] sm:$0xff] (%p3839_p3) }
  0x11   : > { %152 = vst [vmem:[%s131_s27 + $0x10] sm:$0xff] %v151_v2  ;;  %v157_v5 = vld [vmem:[%s134_s26 + $0x68] sm:$0xff]  ;;  %154 = vst [vmem:[%s131_s27 + $0x18] sm:$0xff] %v153_v3  ;;  %v159_v6 = vld [vmem:[%s134_s26 + $0x70] sm:$0xff] }
  0x12   : > { %156 = vst [vmem:[%s131_s27 + $0x20] sm:$0xff] %v155_v4  ;;  %158 = vst [vmem:[%s131_s27 + $0x28] sm:$0xff] %v157_v5  ;;  %v161_v7 = vld [vmem:[%s134_s26 + $0x78] sm:$0xff] }
  0x13   : > { %160 = vst [vmem:[%s131_s27 + $0x30] sm:$0xff] %v159_v6  ;;  %162 = vst [vmem:[%s131_s27 + $0x38] sm:$0xff] %v161_v7 }
  0x14 PF: > { %168 = sbr.rel (!%p3839_p3) target bundleno = 28 (0x1c), region = 47  ;;  %s170_s28 = sand.u32 (%p3839_p3), 1, %s3780_s13  }
  0x15   : > { %s3572_s29 = sshll.u32 (%p3839_p3), %s3784_s14, 5  ;;  %s3237_s30 = sshll.u32 (%p3839_p3), %s170_s28, 6 }
  0x16   : > { %s175_s6 = scalar_lea.vmem (%p3839_p3), %s4445_s2, %s3572_s29  ;;  %s172_s7 = scalar_lea.vmem (%p3839_p3), [#allocation5], %s3237_s30 }
  0x17   : > { %v188_v8 = vld [vmem:[%s175_s6] sm:$0xff] (%p3839_p3)  ;;  %v190_v9 = vld [vmem:[%s175_s6 + $0x8] sm:$0xff] (%p3839_p3)  ;;  %v192_v10 = vld [vmem:[%s175_s6 + $0x10] sm:$0xff] (%p3839_p3) }
  0x18   : > { %189 = vst [vmem:[%s172_s7] sm:$0xff] (%p3839_p3), %v188_v8  ;;  %191 = vst [vmem:[%s172_s7 + $0x8] sm:$0xff] (%p3839_p3), %v190_v9  ;;  %v194_v11 = vld [vmem:[%s175_s6 + $0x18] sm:$0xff] (%p3839_p3)  ;;  %v196_v12 = vld [vmem:[%s175_s6 + $0x60] sm:$0xff] (%p3839_p3) }
  0x19   : > { %193 = vst [vmem:[%s172_s7 + $0x10] sm:$0xff] %v192_v10  ;;  %v198_v13 = vld [vmem:[%s175_s6 + $0x68] sm:$0xff]  ;;  %195 = vst [vmem:[%s172_s7 + $0x18] sm:$0xff] %v194_v11  ;;  %v200_v14 = vld [vmem:[%s175_s6 + $0x70] sm:$0xff] }
  0x1a   : > { %197 = vst [vmem:[%s172_s7 + $0x20] sm:$0xff] %v196_v12  ;;  %199 = vst [vmem:[%s172_s7 + $0x28] sm:$0xff] %v198_v13  ;;  %v202_v15 = vld [vmem:[%s175_s6 + $0x78] sm:$0xff] }
  0x1b   : > { %201 = vst [vmem:[%s172_s7 + $0x30] sm:$0xff] %v200_v14  ;;  %203 = vst [vmem:[%s172_s7 + $0x38] sm:$0xff] %v202_v15 }
  0x1c PF: > { %p3240_p5 = scmp.ge.s32.totalorder %s3784_s14, 1  ;;  %p208_p6 = scmp.lt.s32.totalorder %s3784_s14, 4 }
  0x1e   : > { %p209_p7 = pnand %p3240_p5, %p208_p6 }
  0x1f   : > { %s215_s8 = sand.u32 (!%p209_p7), 1, %s3776_s12   ;;  %p3243_p8 = scmp.ne.s32.totalorder (!%p209_p7), %s3231_s15, 0 }
  0x20   : > { %212 = sbr.rel (%p209_p7) target bundleno = 638 (0x27e), region = 70  ;;  %s3241_s9 = sshll.u32 (!%p209_p7), %s215_s8, 6 }
  0x21   : > { %s3861_s10 = scalar_lea.vmem (!%p209_p7), [#allocation4], %s3241_s9  ;;  %s3863_s11 = scalar_lea.vmem (!%p209_p7), [#allocation5], %s3241_s9 }
  0x25   : > { %249 = sbr.rel (%p3243_p8) target bundleno = 124 (0x7c), region = 82 }
  0x2a   : > { %v250_v16 = vlaneseq  ;;  %v3786_v17 = vmov 1.0|1.0   ;;  %v3787_v20 = vmov 0.0|0.0   ;;  %vm1984_vm0 = vcmask 7168  }
  0x2b   : > { %v3309_v18 = vcombine.low %v3786_v17, %v3786_v17  ;;  %v3311_v19 = vcombine.high %v3786_v17, %v3786_v17  ;;  %v3372_v21 = vcombine.low %v3787_v20, %v3787_v20  ;;  %v3875_v22 = vcombine.high %v3787_v20, %v3787_v20 }
  0x2c   : > { %v3877_v23 = vshrl.u32 %v250_v16, 7  ;;  %v3879_v24 = vand.u32 127, %v250_v16  ;;  %v3788_v25 = vmov 0.0  }
  0x2d   : > { %1857 = vst [vmem:[#allocation2 + $0x3b0] sm:$0xff] %v3309_v18  ;;  %1861 = vst [vmem:[#allocation2 + $0x368] sm:$0xff] %v3309_v18 }
  0x2e   : > { %1865 = vst [vmem:[#allocation2 + $0x110] sm:$0xff] %v3309_v18  ;;  %1869 = vst [vmem:[#allocation2 + $0x150] sm:$0xff] %v3309_v18  ;;  %v252_v26 = vadd.s32 8, %v3877_v23  ;;  %vm320_vm1 = vcmp.le.s32.totalorder %v3877_v23, %v3879_v24  ;;  %v253_v27 = vadd.s32 16, %v3877_v23  ;;  %v254_v28 = vadd.s32 24, %v3877_v23 }
  0x2f   : > { %1873 = vst [vmem:[#allocation2 + $0x388] sm:$0xff] %v3309_v18  ;;  %1877 = vst [vmem:[#allocation2 + $0x1a8] sm:$0xff] %v3309_v18  ;;  %v3244_v29 = vsel %vm320_vm1, 1.0, %v3788_v25  ;;  %v255_v30 = vadd.s32 32, %v3877_v23  ;;  %v256_v31 = vadd.s32 40, %v3877_v23  ;;  %v257_v32 = vadd.s32 48, %v3877_v23 }
  0x30   : > { %1881 = vst [vmem:[#allocation2 + $0x2f8] sm:$0xff] %v3309_v18  ;;  %1885 = vst [vmem:[#allocation2 + $0xc0] sm:$0xff] %v3309_v18  ;;  %vm324_vm2 = vcmp.le.s32.totalorder %v252_v26, %v3879_v24  ;;  %vm328_vm3 = vcmp.le.s32.totalorder %v253_v27, %v3879_v24  ;;  %vm332_vm4 = vcmp.le.s32.totalorder %v254_v28, %v3879_v24  ;;  %v258_v33 = vadd.s32 56, %v3877_v23 }
  0x31   : > { %1889 = vst [vmem:[#allocation2 + $0x3c0] sm:$0xff] %v3309_v18  ;;  %1893 = vst [vmem:[#allocation2 + $0x3f8] sm:$0xff] %v3309_v18  ;;  %v3245_v34 = vsel %vm324_vm2, 1.0, %v3788_v25  ;;  %v3246_v35 = vsel %vm328_vm3, 1.0, %v3788_v25  ;;  %v3247_v36 = vsel %vm332_vm4, 1.0, %v3788_v25  ;;  %vm336_vm5 = vcmp.le.s32.totalorder %v255_v30, %v3879_v24 }
  0x32   : > { %1897 = vst [vmem:[#allocation2 + $0x3f0] sm:$0xff] %v3309_v18  ;;  %1901 = vst [vmem:[#allocation2 + $0x1e0] sm:$0xff] %v3309_v18  ;;  %v1088_v37 = vpack.c.bf16 %v3245_v34, %v3244_v29  ;;  %v1092_v38 = vpack.c.bf16 %v3247_v36, %v3246_v35  ;;  %vm340_vm6 = vcmp.le.s32.totalorder %v256_v31, %v3879_v24  ;;  %v3248_v39 = vsel %vm336_vm5, 1.0, %v3788_v25 }
  0x33   : > { %1905 = vst [vmem:[#allocation2 + $0x240] sm:$0xff] %v3309_v18  ;;  %1909 = vst [vmem:[#allocation2 + $0xd0] sm:$0xff] %v3309_v18  ;;  %v3249_v40 = vsel %vm340_vm6, 1.0, %v3788_v25  ;;  %vm344_vm7 = vcmp.le.s32.totalorder %v257_v32, %v3879_v24  ;;  %vm348_vm8 = vcmp.le.s32.totalorder %v258_v33, %v3879_v24  ;;  %v259_v41 = vadd.s32 64, %v3877_v23 }
  0x34   : > { %1913 = vst [vmem:[#allocation2 + $0x268] sm:$0xff] %v3309_v18  ;;  %1917 = vst [vmem:[#allocation2 + $0x30] sm:$0xff] %v3309_v18  ;;  %v3308_v42 = vcombine.low %v1088_v37, %v3786_v17  ;;  %v3310_v43 = vcombine.high %v1088_v37, %v3786_v17  ;;  %v3312_v44 = vcombine.low %v1092_v38, %v3786_v17  ;;  %v3250_v47 = vsel %vm344_vm7, 1.0, %v3788_v25 }
  0x35   : > { %1859 = vst [vmem:[#allocation2 + $0x18] sm:$0xff] %v3311_v19  ;;  %1863 = vst [vmem:[#allocation2 + $0x48] sm:$0xff] %v3311_v19  ;;  %v3314_v45 = vcombine.high %v1092_v38, %v3786_v17  ;;  %v1096_v46 = vpack.c.bf16 %v3249_v40, %v3248_v39  ;;  %v3251_v48 = vsel %vm348_vm8, 1.0, %v3788_v25  ;;  %v260_v49 = vadd.s32 72, %v3877_v23 }
  0x36   : > { %1867 = vst [vmem:[#allocation2 + $0x98] sm:$0xff] %v3311_v19  ;;  %1871 = vst [vmem:[#allocation2 + $0x60] sm:$0xff] %v3311_v19  ;;  %v1100_v50 = vpack.c.bf16 %v3251_v48, %v3250_v47  ;;  %vm352_vm9 = vcmp.le.s32.totalorder %v259_v41, %v3879_v24  ;;  %v261_v51 = vadd.s32 80, %v3877_v23  ;;  %v262_v52 = vadd.s32 88, %v3877_v23 }
  0x37   : > { %1875 = vst [vmem:[#allocation2 + $0x340] sm:$0xff] %v3311_v19  ;;  %1879 = vst [vmem:[#allocation2 + $0x168] sm:$0xff] %v3311_v19  ;;  %v3316_v53 = vcombine.low %v1096_v46, %v3786_v17  ;;  %v3318_v54 = vcombine.high %v1096_v46, %v3786_v17  ;;  %vm356_vm10 = vcmp.le.s32.totalorder %v260_v49, %v3879_v24  ;;  %v3252_v55 = vsel %vm352_vm9, 1.0, %v3788_v25 }
  0x38   : > { %1883 = vst [vmem:[#allocation2 + $0x28] sm:$0xff] %v3311_v19  ;;  %1887 = vst [vmem:[#allocation2 + $0x280] sm:$0xff] %v3311_v19  ;;  %v3320_v56 = vcombine.low %v1100_v50, %v3786_v17  ;;  %v3322_v57 = vcombine.high %v1100_v50, %v3786_v17  ;;  %v3253_v58 = vsel %vm356_vm10, 1.0, %v3788_v25  ;;  %vm360_vm11 = vcmp.le.s32.totalorder %v261_v51, %v3879_v24 }
  0x39   : > { %1891 = vst [vmem:[#allocation2 + $0x3e0] sm:$0xff] %v3311_v19  ;;  %1895 = vst [vmem:[#allocation2 + $0x128] sm:$0xff] %v3311_v19  ;;  %v1104_v59 = vpack.c.bf16 %v3253_v58, %v3252_v55  ;;  %vm364_vm12 = vcmp.le.s32.totalorder %v262_v52, %v3879_v24  ;;  %v3254_v60 = vsel %vm360_vm11, 1.0, %v3788_v25  ;;  %v263_v61 = vadd.s32 96, %v3877_v23 }
  0x3a   : > { %1899 = vst [vmem:[#allocation2 + $0x2c0] sm:$0xff] %v3311_v19  ;;  %1903 = vst [vmem:[#allocation2 + $0x10] sm:$0xff] %v3311_v19  ;;  %v3255_v62 = vsel %vm364_vm12, 1.0, %v3788_v25  ;;  %v264_v63 = vadd.s32 104, %v3877_v23  ;;  %v265_v0 = vadd.s32 112, %v3877_v23  ;;  %v266_v1 = vadd.s32 120, %v3877_v23 }
  0x3b   : > { %1907 = vst [vmem:[#allocation2 + $0x3a0] sm:$0xff] %v3311_v19  ;;  %1911 = vst [vmem:[#allocation2 + $0x2f0] sm:$0xff] %v3311_v19  ;;  %v3324_v2 = vcombine.low %v1104_v59, %v3786_v17  ;;  %v3326_v3 = vcombine.high %v1104_v59, %v3786_v17  ;;  %v1108_v4 = vpack.c.bf16 %v3255_v62, %v3254_v60  ;;  %v267_v12 = vadd.s32 128, %v3877_v23 }
  0x3c   : > { %1915 = vst [vmem:[#allocation2 + $0x188] sm:$0xff] %v3311_v19  ;;  %1919 = vst [vmem:[#allocation2 + $0x2a8] sm:$0xff] %v3311_v19  ;;  %vm368_vm13 = vcmp.le.s32.totalorder %v263_v61, %v3879_v24  ;;  %vm372_vm14 = vcmp.le.s32.totalorder %v264_v63, %v3879_v24  ;;  %vm376_vm15 = vcmp.le.s32.totalorder %v265_v0, %v3879_v24  ;;  %v268_v13 = vadd.s32 136, %v3877_v23 }
  0x3d   : > { %1920 = vst [vmem:[#allocation2 + $0x130] sm:$0xff] %v3372_v21  ;;  %1924 = vst [vmem:[#allocation2 + $0x70] sm:$0xff] %v3372_v21  ;;  %v3256_v5 = vsel %vm368_vm13, 1.0, %v3788_v25  ;;  %v3328_v6 = vcombine.low %v1108_v4, %v3786_v17  ;;  %v3330_v7 = vcombine.high %v1108_v4, %v3786_v17  ;;  %v3257_v8 = vsel %vm372_vm14, 1.0, %v3788_v25 }
  0x3e   : > { %1928 = vst [vmem:[#allocation2 + $0x328] sm:$0xff] %v3372_v21  ;;  %1932 = vst [vmem:[#allocation2 + $0x248] sm:$0xff] %v3372_v21  ;;  %v3258_v9 = vsel %vm376_vm15, 1.0, %v3788_v25  ;;  %v1112_v10 = vpack.c.bf16 %v3257_v8, %v3256_v5  ;;  %v3974_v15 = vadd.s32 128, %v3879_v24  ;;  %v269_v16 = vadd.s32 144, %v3877_v23 }
  0x3f   : > { %1936 = vst [vmem:[#allocation2 + $0x288] sm:$0xff] %v3372_v21  ;;  %1940 = vst [vmem:[#allocation2 + $0x2c8] sm:$0xff] %v3372_v21  ;;  %v270_v18 = vadd.s32 152, %v3877_v23  ;;  %v272_v26 = vadd.s32 168, %v3877_v23  ;;  %v273_v36 = vadd.s32 176, %v3877_v23  ;;  %v274_v40 = vadd.s32 184, %v3877_v23 }
  0x40   : > { %1944 = vst [vmem:[#allocation2 + $0x1b0] sm:$0xff] %v3372_v21  ;;  %1948 = vst [vmem:[#allocation2 + $0x58] sm:$0xff] %v3372_v21  ;;  %v3332_v19 = vcombine.low %v1112_v10, %v3786_v17  ;;  %vm385_vm1 = vcmp.le.s32.totalorder %v267_v12, %v3974_v15  ;;  %vm389_vm2 = vcmp.le.s32.totalorder %v268_v13, %v3974_v15  ;;  %v276_v46 = vadd.s32 200, %v3877_v23 }
  0x41   : > { %1952 = vst [vmem:[#allocation2 + $0x1f8] sm:$0xff] %v3372_v21  ;;  %1956 = vst [vmem:[#allocation2 + $0x1a0] sm:$0xff] %v3372_v21  ;;  %v3260_v29 = vsel %vm385_vm1, 1.0, %v3788_v25  ;;  %v3261_v30 = vsel %vm389_vm2, 1.0, %v3788_v25  ;;  %vm393_vm3 = vcmp.le.s32.totalorder %v269_v16, %v3974_v15  ;;  %vm397_vm4 = vcmp.le.s32.totalorder %v270_v18, %v3974_v15 }
  0x42   : > { %1960 = vst [vmem:[#allocation2 + $0xf0] sm:$0xff] %v3372_v21  ;;  %1964 = vst [vmem:[#allocation2 + $0x250] sm:$0xff] %v3372_v21  ;;  %v1121_v31 = vpack.c.bf16 %v3261_v30, %v3260_v29  ;;  %v3262_v32 = vsel %vm393_vm3, 1.0, %v3788_v25  ;;  %v3263_v33 = vsel %vm397_vm4, 1.0, %v3788_v25  ;;  %vm405_vm6 = vcmp.le.s32.totalorder %v272_v26, %v3974_v15 }
  0x43   : > { %1968 = vst [vmem:[#allocation2 + $0x78] sm:$0xff] %v3372_v21  ;;  %1972 = vst [vmem:[#allocation2 + $0x278] sm:$0xff] %v3372_v21  ;;  %v1125_v34 = vpack.c.bf16 %v3263_v33, %v3262_v32  ;;  %v3265_v39 = vsel %vm405_vm6, 1.0, %v3788_v25  ;;  %vm409_vm7 = vcmp.le.s32.totalorder %v273_v36, %v3974_v15  ;;  %vm413_vm8 = vcmp.le.s32.totalorder %v274_v40, %v3974_v15 }
  0x44   : > { %1976 = vst [vmem:[#allocation2 + $0x148] sm:$0xff] %v3372_v21  ;;  %1980 = vst [vmem:[#allocation2 + $0x298] sm:$0xff] %v3372_v21  ;;  %v3334_v21 = vcombine.high %v1112_v10, %v3786_v17  ;;  %v3340_v37 = vcombine.low %v3787_v20, %v1121_v31  ;;  %v3342_v38 = vcombine.high %v3787_v20, %v1121_v31  ;;  %v3267_v49 = vsel %vm413_vm8, 1.0, %v3788_v25 }
  0x45   : > { %1922 = vst [vmem:[#allocation2 + $0x318] sm:$0xff] %v3875_v22  ;;  %1926 = vst [vmem:[#allocation2 + $0xe0] sm:$0xff] %v3875_v22  ;;  %v3344_v41 = vcombine.low %v3787_v20, %v1125_v34  ;;  %v277_v50 = vadd.s32 208, %v3877_v23  ;;  %vm421_vm10 = vcmp.le.s32.totalorder %v276_v46, %v3974_v15  ;;  %v278_v52 = vadd.s32 216, %v3877_v23 }
  0x46   : > { %1930 = vst [vmem:[#allocation2 + $0x3b8] sm:$0xff] %v3875_v22  ;;  %1934 = vst [vmem:[#allocation2 + $0x20] sm:$0xff] %v3875_v22  ;;  %v279_v55 = vadd.s32 224, %v3877_v23  ;;  %v280_v61 = vadd.s32 232, %v3877_v23  ;;  %v283_v4 = vadd.s32 256, %v3877_v23  ;;  %v284_v8 = vadd.s32 264, %v3877_v23 }
  0x47   : > { %1938 = vst [vmem:[#allocation2 + $0x3c8] sm:$0xff] %v3875_v22  ;;  %1942 = vst [vmem:[#allocation2 + $0x3d8] sm:$0xff] %v3875_v22  ;;  %vm425_vm11 = vcmp.le.s32.totalorder %v277_v50, %v3974_v15  ;;  %vm429_vm12 = vcmp.le.s32.totalorder %v278_v52, %v3974_v15  ;;  %v4039_v10 = vadd.s32 256, %v3879_v24  ;;  %v285_v13 = vadd.s32 272, %v3877_v23 }
  0x48   : > { %1946 = vst [vmem:[#allocation2 + $0x2d0] sm:$0xff] %v3875_v22  ;;  %1950 = vst [vmem:[#allocation2 + $0x198] sm:$0xff] %v3875_v22  ;;  %v3270_v59 = vsel %vm425_vm11, 1.0, %v3788_v25  ;;  %v3271_v60 = vsel %vm429_vm12, 1.0, %v3788_v25  ;;  %vm433_vm13 = vcmp.le.s32.totalorder %v279_v55, %v3974_v15  ;;  %vm437_vm14 = vcmp.le.s32.totalorder %v280_v61, %v3974_v15 }
  0x49   : > { %1954 = vst [vmem:[#allocation2 + $0x398] sm:$0xff] %v3875_v22  ;;  %1958 = vst [vmem:[#allocation2 + $0x258] sm:$0xff] %v3875_v22  ;;  %v1141_v0 = vpack.c.bf16 %v3271_v60, %v3270_v59  ;;  %vm450_vm1 = vcmp.le.s32.totalorder %v283_v4, %v4039_v10  ;;  %vm454_vm2 = vcmp.le.s32.totalorder %v284_v8, %v4039_v10  ;;  %v287_v30 = vadd.s32 288, %v3877_v23 }
  0x4a   : > { %1962 = vst [vmem:[#allocation2 + $0x170] sm:$0xff] %v3875_v22  ;;  %1966 = vst [vmem:[#allocation2 + $0xb8] sm:$0xff] %v3875_v22  ;;  %vm458_vm3 = vcmp.le.s32.totalorder %v285_v13, %v4039_v10  ;;  %v3277_v26 = vsel %vm454_vm2, 1.0, %v3788_v25  ;;  %v288_v31 = vadd.s32 296, %v3877_v23  ;;  %v289_v33 = vadd.s32 304, %v3877_v23 }
  0x4b   : > { %1970 = vst [vmem:[#allocation2 + $0x370] sm:$0xff] %v3875_v22  ;;  %1974 = vst [vmem:[#allocation2 + $0x228] sm:$0xff] %v3875_v22  ;;  %v3360_v5 = vcombine.low %v3787_v20, %v1141_v0  ;;  %v293_v46 = vadd.s32 336, %v3877_v23  ;;  %v294_v52 = vadd.s32 344, %v3877_v23  ;;  %v297_v59 = vadd.s32 368, %v3877_v23 }
  0x4c   : > { %1978 = vst [vmem:[#allocation2 + $0x68] sm:$0xff] %v3875_v22  ;;  %1982 = vst [vmem:[#allocation2 + $0x310] sm:$0xff] %v3875_v22  ;;  %v271_v22 = vadd.s32 160, %v3877_v23  ;;  %vm470_vm6 = vcmp.le.s32.totalorder %v288_v31, %v4039_v10 }
  0x4d   : > { %1985 = vst.msk [vmem:[#allocation3] sm:$0xff] %vm1984_vm0, %v3788_v25  ;;  %1986 = vst.msk [vmem:[#allocation3 + $0x8] sm:$0xff] %vm1984_vm0, %v3788_v25  ;;  %vm490_vm11 = vcmp.le.s32.totalorder %v293_v46, %v4039_v10  ;;  %vm494_vm12 = vcmp.le.s32.totalorder %v294_v52, %v4039_v10 }
  0x4e   : > { %1987 = vst.msk [vmem:[%s4446_s3] sm:$0xff] %vm1984_vm0, %v3788_v25  ;;  %1988 = vst.msk [vmem:[%s4446_s3 + $0x8] sm:$0xff] %vm1984_vm0, %v3788_v25  ;;  %vm380_vm0 = vcmp.le.s32.totalorder %v266_v1, %v3879_v24  ;;  %vm401_vm5 = vcmp.le.s32.totalorder %v271_v22, %v3974_v15  ;;  %v3272_v1 = vsel %vm433_vm13, 1.0, %v3788_v25 }
  0x4f   : > { %1856 = vst [vmem:[#allocation2 + $0x2b0] sm:$0xff] %v3308_v42  ;;  %1858 = vst [vmem:[#allocation2 + $0xd8] sm:$0xff] %v3310_v43  ;;  %v3259_v11 = vsel %vm380_vm0, 1.0, %v3788_v25  ;;  %v3264_v35 = vsel %vm401_vm5, 1.0, %v3788_v25  ;;  %v3346_v42 = vcombine.high %v3787_v20, %v1125_v34  ;;  %v290_v34 = vadd.s32 312, %v3877_v23 }
  0x50   : > { %1860 = vst [vmem:[#allocation2 + $0x50] sm:$0xff] %v3312_v44  ;;  %1862 = vst [vmem:[#allocation2 + $0x330] sm:$0xff] %v3314_v45  ;;  %v1116_v14 = vpack.c.bf16 %v3259_v11, %v3258_v9  ;;  %v1129_v43 = vpack.c.bf16 %v3265_v39, %v3264_v35  ;;  %v3266_v44 = vsel %vm409_vm7, 1.0, %v3788_v25  ;;  %v275_v45 = vadd.s32 192, %v3877_v23 }
  0x51   : > { %1864 = vst [vmem:[#allocation2 + $0x380] sm:$0xff] %v3316_v53  ;;  %1866 = vst [vmem:[#allocation2 + $0x118] sm:$0xff] %v3318_v54  ;;  %v1133_v51 = vpack.c.bf16 %v3267_v49, %v3266_v44  ;;  %v3269_v54 = vsel %vm421_vm10, 1.0, %v3788_v25  ;;  %v291_v35 = vadd.s32 320, %v3877_v23  ;;  %vm466_vm5 = vcmp.le.s32.totalorder %v287_v30, %v4039_v10 }
  0x52   : > { %1868 = vst [vmem:[#allocation2 + $0x320] sm:$0xff] %v3320_v56  ;;  %1870 = vst [vmem:[#allocation2 + $0x108] sm:$0xff] %v3322_v57  ;;  %v3336_v27 = vcombine.low %v1116_v14, %v3786_v17  ;;  %v3338_v28 = vcombine.high %v1116_v14, %v3786_v17  ;;  %v3348_v47 = vcombine.low %v3787_v20, %v1129_v43  ;;  %v286_v14 = vadd.s32 280, %v3877_v23 }
  0x53   : > { %1872 = vst [vmem:[#allocation2 + $0x2e0] sm:$0xff] %v3324_v2  ;;  %1874 = vst [vmem:[#allocation2 + $0x338] sm:$0xff] %v3326_v3  ;;  %v3350_v48 = vcombine.high %v3787_v20, %v1129_v43  ;;  %vm417_vm9 = vcmp.le.s32.totalorder %v275_v45, %v3974_v15  ;;  %v3352_v56 = vcombine.low %v3787_v20, %v1133_v51  ;;  %v281_v2 = vadd.s32 240, %v3877_v23 }
  0x54   : > { %1876 = vst [vmem:[#allocation2 + $0x80] sm:$0xff] %v3328_v6  ;;  %1878 = vst [vmem:[#allocation2 + $0x1b8] sm:$0xff] %v3330_v7  ;;  %v3268_v53 = vsel %vm417_vm9, 1.0, %v3788_v25  ;;  %v3354_v57 = vcombine.high %v3787_v20, %v1133_v51  ;;  %v282_v3 = vadd.s32 248, %v3877_v23  ;;  %v3362_v6 = vcombine.high %v3787_v20, %v1141_v0 }
  0x55   : > { %1880 = vst [vmem:[#allocation2 + $0x3e8] sm:$0xff] %v3332_v19  ;;  %1882 = vst [vmem:[#allocation2 + $0x290] sm:$0xff] %v3334_v21  ;;  %v1137_v58 = vpack.c.bf16 %v3269_v54, %v3268_v53  ;;  %v3273_v7 = vsel %vm437_vm14, 1.0, %v3788_v25  ;;  %vm441_vm15 = vcmp.le.s32.totalorder %v281_v2, %v3974_v15  ;;  %vm462_vm4 = vcmp.le.s32.totalorder %v286_v14, %v4039_v10 }
  0x56   : > { %1884 = vst [vmem:[#allocation2 + $0x138] sm:$0xff] %v3336_v27  ;;  %1886 = vst [vmem:[#allocation2 + $0x1c0] sm:$0xff] %v3338_v28  ;;  %v1145_v9 = vpack.c.bf16 %v3273_v7, %v3272_v1  ;;  %vm445_vm0 = vcmp.le.s32.totalorder %v282_v3, %v3974_v15  ;;  %v3274_v11 = vsel %vm441_vm15, 1.0, %v3788_v25  ;;  %v3276_v15 = vsel %vm450_vm1, 1.0, %v3788_v25 }
  0x57   : > { %1888 = vst [vmem:[#allocation2 + $0x100] sm:$0xff] %v3340_v37  ;;  %1890 = vst [vmem:[#allocation2 + $0x158] sm:$0xff] %v3342_v38  ;;  %v3356_v62 = vcombine.low %v3787_v20, %v1137_v58  ;;  %v3358_v63 = vcombine.high %v3787_v20, %v1137_v58  ;;  %v3275_v12 = vsel %vm445_vm0, 1.0, %v3788_v25  ;;  %v3278_v27 = vsel %vm458_vm3, 1.0, %v3788_v25 }
  0x58   : > { %1892 = vst [vmem:[#allocation2 + $0x218] sm:$0xff] %v3344_v41  ;;  %1894 = vst [vmem:[#allocation2 + $0x8] sm:$0xff] %v3346_v42  ;;  %v3364_v16 = vcombine.low %v3787_v20, %v1145_v9  ;;  %v3366_v18 = vcombine.high %v3787_v20, %v1145_v9  ;;  %v1149_v19 = vpack.c.bf16 %v3275_v12, %v3274_v11  ;;  %v3279_v29 = vsel %vm462_vm4, 1.0, %v3788_v25 }
  0x59   : > { %1896 = vst [vmem:[#allocation2 + $0x2a0] sm:$0xff] %v3348_v47  ;;  %1898 = vst [vmem:[#allocation2 + $0xa0] sm:$0xff] %v3350_v48  ;;  %v1154_v28 = vpack.c.bf16 %v3277_v26, %v3276_v15  ;;  %v1158_v32 = vpack.c.bf16 %v3279_v29, %v3278_v27  ;;  %v3280_v40 = vsel %vm466_vm5, 1.0, %v3788_v25  ;;  %v3281_v41 = vsel %vm470_vm6, 1.0, %v3788_v25 }
  0x5a   : > { %1900 = vst [vmem:[#allocation2 + $0xb0] sm:$0xff] %v3352_v56  ;;  %1902 = vst [vmem:[#allocation2 + $0x1f0] sm:$0xff] %v3354_v57  ;;  %v3368_v21 = vcombine.low %v3787_v20, %v1149_v19  ;;  %v3370_v22 = vcombine.high %v3787_v20, %v1149_v19  ;;  %v1162_v42 = vpack.c.bf16 %v3281_v41, %v3280_v40  ;;  %v292_v43 = vadd.s32 328, %v3877_v23 }
  0x5b   : > { %1904 = vst [vmem:[#allocation2 + $0x230] sm:$0xff] %v3356_v62  ;;  %1906 = vst [vmem:[#allocation2 + $0x90] sm:$0xff] %v3358_v63  ;;  %v3373_v36 = vcombine.low %v1154_v28, %v3786_v17  ;;  %v3375_v37 = vcombine.high %v1154_v28, %v3786_v17  ;;  %v3377_v38 = vcombine.low %v1158_v32, %v3786_v17  ;;  %v3286_v56 = vsel %vm490_vm11, 1.0, %v3788_v25 }
  0x5c   : > { %1908 = vst [vmem:[#allocation2 + $0x208] sm:$0xff] %v3360_v5  ;;  %1910 = vst [vmem:[#allocation2 + $0x88] sm:$0xff] %v3362_v6  ;;  %v3379_v39 = vcombine.high %v1158_v32, %v3786_v17  ;;  %vm474_vm7 = vcmp.le.s32.totalorder %v289_v33, %v4039_v10  ;;  %vm478_vm8 = vcmp.le.s32.totalorder %v290_v34, %v4039_v10  ;;  %v295_v57 = vadd.s32 352, %v3877_v23 }
  0x5d   : > { %1912 = vst [vmem:[#allocation2 + $0x358] sm:$0xff] %v3364_v16  ;;  %1914 = vst [vmem:[#allocation2 + $0x350] sm:$0xff] %v3366_v18  ;;  %v3282_v44 = vsel %vm474_vm7, 1.0, %v3788_v25  ;;  %v3283_v45 = vsel %vm478_vm8, 1.0, %v3788_v25  ;;  %vm482_vm9 = vcmp.le.s32.totalorder %v291_v35, %v4039_v10  ;;  %v3381_v47 = vcombine.low %v1162_v42, %v3786_v17 }
  0x5e   : > { %1916 = vst [vmem:[#allocation2 + $0x1d8] sm:$0xff] %v3368_v21  ;;  %1918 = vst [vmem:[#allocation2 + $0x140] sm:$0xff] %v3370_v22  ;;  %v3383_v48 = vcombine.high %v1162_v42, %v3786_v17  ;;  %v1166_v49 = vpack.c.bf16 %v3283_v45, %v3282_v44  ;;  %vm486_vm10 = vcmp.le.s32.totalorder %v292_v43, %v4039_v10  ;;  %v3284_v50 = vsel %vm482_vm9, 1.0, %v3788_v25 }
  0x5f   : > { %1921 = vst [vmem:[#allocation2 + $0x200] sm:$0xff] %v3373_v36  ;;  %1923 = vst [vmem:[#allocation2 + $0x220] sm:$0xff] %v3375_v37  ;;  %v3285_v51 = vsel %vm486_vm10, 1.0, %v3788_v25  ;;  %v296_v58 = vadd.s32 360, %v3877_v23  ;;  %v3287_v62 = vsel %vm494_vm12, 1.0, %v3788_v25  ;;  %v298_v63 = vadd.s32 376, %v3877_v23 }
  0x60   : > { %1925 = vst [vmem:[#allocation2 + $0x300] sm:$0xff] %v3377_v38  ;;  %1927 = vst [vmem:[#allocation2 + $0x178] sm:$0xff] %v3379_v39  ;;  %v3385_v53 = vcombine.low %v1166_v49, %v3786_v17  ;;  %v3387_v54 = vcombine.high %v1166_v49, %v3786_v17  ;;  %v1170_v55 = vpack.c.bf16 %v3285_v51, %v3284_v50  ;;  %v299_v9 = vadd.s32 384, %v3877_v23 }
  0x61   : > { %1929 = vst [vmem:[#allocation2 + $0x260] sm:$0xff] %v3381_v47  ;;  %1931 = vst [vmem:[#allocation2 + $0x2b8] sm:$0xff] %v3383_v48  ;;  %v1174_v0 = vpack.c.bf16 %v3287_v62, %v3286_v56  ;;  %vm498_vm13 = vcmp.le.s32.totalorder %v295_v57, %v4039_v10  ;;  %vm502_vm14 = vcmp.le.s32.totalorder %v296_v58, %v4039_v10  ;;  %v300_v11 = vadd.s32 392, %v3877_v23 }
  0x62   : > { %1933 = vst [vmem:[#allocation2 + $0x40] sm:$0xff] %v3385_v53  ;;  %1935 = vst [vmem:[#allocation2 + $0xe8] sm:$0xff] %v3387_v54  ;;  %v3389_v60 = vcombine.low %v1170_v55, %v3786_v17  ;;  %v3391_v61 = vcombine.high %v1170_v55, %v3786_v17  ;;  %vm506_vm15 = vcmp.le.s32.totalorder %v297_v59, %v4039_v10  ;;  %v3288_v1 = vsel %vm498_vm13, 1.0, %v3788_v25 }
  0x63   : > { %v3289_v2 = vsel %vm502_vm14, 1.0, %v3788_v25  ;;  %vm510_vm0 = vcmp.le.s32.totalorder %v298_v63, %v4039_v10  ;;  %v3290_v3 = vsel %vm506_vm15, 1.0, %v3788_v25  ;;  %v3393_v4 = vcombine.low %v1174_v0, %v3786_v17 }
  0x64   : > { %1937 = vst [vmem:[#allocation2 + $0x3a8] sm:$0xff] %v3389_v60  ;;  %1939 = vst [vmem:[#allocation2 + $0x160] sm:$0xff] %v3391_v61  ;;  %v3395_v5 = vcombine.high %v1174_v0, %v3786_v17  ;;  %v1178_v6 = vpack.c.bf16 %v3289_v2, %v3288_v1  ;;  %v3291_v7 = vsel %vm510_vm0, 1.0, %v3788_v25  ;;  %v4108_v12 = vadd.s32 384, %v3879_v24 }
  0x65   : > { %v1182_v8 = vpack.c.bf16 %v3291_v7, %v3290_v3  ;;  %1941 = vst [vmem:[#allocation2 + $0x210] sm:$0xff] %v3393_v4  ;;  %v301_v14 = vadd.s32 400, %v3877_v23  ;;  %v302_v16 = vadd.s32 408, %v3877_v23  ;;  %v303_v26 = vadd.s32 416, %v3877_v23 }
  0x66   : > { %1943 = vst [vmem:[#allocation2 + $0x1e8] sm:$0xff] %v3395_v5  ;;  %v3397_v10 = vcombine.low %v1178_v6, %v3786_v17  ;;  %v3399_v13 = vcombine.high %v1178_v6, %v3786_v17  ;;  %vm515_vm1 = vcmp.le.s32.totalorder %v299_v9, %v4108_v12  ;;  %vm519_vm2 = vcmp.le.s32.totalorder %v300_v11, %v4108_v12 }
  0x67   : > { %v3401_v18 = vcombine.low %v1182_v8, %v3786_v17  ;;  %v3403_v19 = vcombine.high %v1182_v8, %v3786_v17  ;;  %v3292_v24 = vsel %vm515_vm1, 1.0, %v3788_v25  ;;  %v3293_v15 = vsel %vm519_vm2, 1.0, %v3788_v25 }
  0x68   : > { %1945 = vst [vmem:[#allocation2 + $0x1c8] sm:$0xff] %v3397_v10  ;;  %1947 = vst [vmem:[#allocation2 + $0x1d0] sm:$0xff] %v3399_v13  ;;  %vm523_vm3 = vcmp.le.s32.totalorder %v301_v14, %v4108_v12  ;;  %vm527_vm4 = vcmp.le.s32.totalorder %v302_v16, %v4108_v12  ;;  %v1187_v21 = vpack.c.bf16 %v3293_v15, %v3292_v24  ;;  %v304_v28 = vadd.s32 424, %v3877_v23 }
  0x69   : > { %1949 = vst [vmem:[#allocation2 + $0x120] sm:$0xff] %v3401_v18  ;;  %1951 = vst [vmem:[#allocation2 + $0x2e8] sm:$0xff] %v3403_v19  ;;  %v3294_v22 = vsel %vm523_vm3, 1.0, %v3788_v25  ;;  %v3295_v17 = vsel %vm527_vm4, 1.0, %v3788_v25  ;;  %v305_v29 = vadd.s32 432, %v3877_v23  ;;  %v306_v30 = vadd.s32 440, %v3877_v23 }
  0x6a   : > { %v1191_v27 = vpack.c.bf16 %v3295_v17, %v3294_v22  ;;  %v3405_v31 = vcombine.low %v3787_v20, %v1187_v21  ;;  %v3407_v32 = vcombine.high %v3787_v20, %v1187_v21  ;;  %vm531_vm5 = vcmp.le.s32.totalorder %v303_v26, %v4108_v12 }
  0x6b   : > { %v307_v33 = vadd.s32 448, %v3877_v23  ;;  %vm535_vm6 = vcmp.le.s32.totalorder %v304_v28, %v4108_v12  ;;  %v3296_v36 = vsel %vm531_vm5, 1.0, %v3788_v25  ;;  %vm539_vm7 = vcmp.le.s32.totalorder %v305_v29, %v4108_v12 }
  0x6c   : > { %v3409_v34 = vcombine.low %v3787_v20, %v1191_v27  ;;  %v3411_v35 = vcombine.high %v3787_v20, %v1191_v27  ;;  %1953 = vst [vmem:[#allocation2 + $0x238] sm:$0xff] %v3405_v31  ;;  %1955 = vst [vmem:[#allocation2 + $0x390] sm:$0xff] %v3407_v32  ;;  %v3297_v37 = vsel %vm535_vm6, 1.0, %v3788_v25  ;;  %vm543_vm8 = vcmp.le.s32.totalorder %v306_v30, %v4108_v12 }
  0x6d   : > { %v308_v38 = vadd.s32 456, %v3877_v23  ;;  %v1195_v39 = vpack.c.bf16 %v3297_v37, %v3296_v36  ;;  %v3298_v40 = vsel %vm539_vm7, 1.0, %v3788_v25  ;;  %v3299_v41 = vsel %vm543_vm8, 1.0, %v3788_v25 }
  0x6e   : > { %1957 = vst [vmem:[#allocation2 + $0xa8] sm:$0xff] %v3409_v34  ;;  %1959 = vst [vmem:[#allocation2 + $0x2d8] sm:$0xff] %v3411_v35  ;;  %vm547_vm9 = vcmp.le.s32.totalorder %v307_v33, %v4108_v12  ;;  %v1199_v42 = vpack.c.bf16 %v3299_v41, %v3298_v40  ;;  %v309_v44 = vadd.s32 464, %v3877_v23  ;;  %v310_v48 = vadd.s32 472, %v3877_v23 }
  0x6f   : > { %vm551_vm10 = vcmp.le.s32.totalorder %v308_v38, %v4108_v12  ;;  %v3300_v43 = vsel %vm547_vm9, 1.0, %v3788_v25  ;;  %v3413_v45 = vcombine.low %v3787_v20, %v1195_v39  ;;  %v3415_v46 = vcombine.high %v3787_v20, %v1195_v39 }
  0x70   : > { %v3301_v47 = vsel %vm551_vm10, 1.0, %v3788_v25  ;;  %v3417_v49 = vcombine.low %v3787_v20, %v1199_v42  ;;  %v3419_v50 = vcombine.high %v3787_v20, %v1199_v42  ;;  %vm555_vm11 = vcmp.le.s32.totalorder %v309_v44, %v4108_v12 }
  0x71   : > { %v1203_v51 = vpack.c.bf16 %v3301_v47, %v3300_v43  ;;  %1961 = vst [vmem:[#allocation2 + $0x180] sm:$0xff] %v3413_v45  ;;  %1963 = vst [vmem:[#allocation2 + $0x3d0] sm:$0xff] %v3415_v46  ;;  %vm559_vm12 = vcmp.le.s32.totalorder %v310_v48, %v4108_v12  ;;  %v3302_v52 = vsel %vm555_vm11, 1.0, %v3788_v25  ;;  %v311_v53 = vadd.s32 480, %v3877_v23 }
  0x72   : > { %v312_v54 = vadd.s32 488, %v3877_v23  ;;  %1965 = vst [vmem:[#allocation2 + $0x378] sm:$0xff] %v3417_v49  ;;  %1967 = vst [vmem:[#allocation2 + $0x38] sm:$0xff] %v3419_v50  ;;  %v3303_v57 = vsel %vm559_vm12, 1.0, %v3788_v25  ;;  %v313_v58 = vadd.s32 496, %v3877_v23  ;;  %v314_v60 = vadd.s32 504, %v3877_v23 }
  0x73   : > { %v3421_v55 = vcombine.low %v3787_v20, %v1203_v51  ;;  %v3423_v56 = vcombine.high %v3787_v20, %v1203_v51  ;;  %v1207_v59 = vpack.c.bf16 %v3303_v57, %v3302_v52  ;;  %vm563_vm13 = vcmp.le.s32.totalorder %v311_v53, %v4108_v12 }
  0x74   : > { %vm567_vm14 = vcmp.le.s32.totalorder %v312_v54, %v4108_v12  ;;  %v3304_v61 = vsel %vm563_vm13, 1.0, %v3788_v25  ;;  %vm571_vm15 = vcmp.le.s32.totalorder %v313_v58, %v4108_v12  ;;  %vm575_vm0 = vcmp.le.s32.totalorder %v314_v60, %v4108_v12 }
  0x75   : > { %1969 = vst [vmem:[#allocation2 + $0x308] sm:$0xff] %v3421_v55  ;;  %1971 = vst [vmem:[#allocation2 + $0xc8] sm:$0xff] %v3423_v56  ;;  %v3305_v62 = vsel %vm567_vm14, 1.0, %v3788_v25  ;;  %v3425_v63 = vcombine.low %v3787_v20, %v1207_v59  ;;  %v3427_v0 = vcombine.high %v3787_v20, %v1207_v59  ;;  %v3306_v2 = vsel %vm571_vm15, 1.0, %v3788_v25 }
  0x76   : > { %v1211_v1 = vpack.c.bf16 %v3305_v62, %v3304_v61  ;;  %v3307_v3 = vsel %vm575_vm0, 1.0, %v3788_v25 }
  0x77   : > { %1973 = vst [vmem:[#allocation2 + $0x360] sm:$0xff] %v3425_v63  ;;  %1975 = vst [vmem:[#allocation2 + $0x348] sm:$0xff] %v3427_v0  ;;  %v1215_v5 = vpack.c.bf16 %v3307_v3, %v3306_v2 }
  0x78   : > { %v3429_v23 = vcombine.low %v3787_v20, %v1211_v1  ;;  %v3431_v4 = vcombine.high %v3787_v20, %v1211_v1 }
  0x79   : > { %v3433_v6 = vcombine.low %v3787_v20, %v1215_v5  ;;  %v3435_v7 = vcombine.high %v3787_v20, %v1215_v5 }
  0x7a   : > { %1977 = vst [vmem:[#allocation2 + $0xf8] sm:$0xff] %v3429_v23  ;;  %1979 = vst [vmem:[#allocation2] sm:$0xff] %v3431_v4 }
  0x7b   : > { %1981 = vst [vmem:[#allocation2 + $0x270] sm:$0xff] %v3433_v6  ;;  %1983 = vst [vmem:[#allocation2 + $0x190] sm:$0xff] %v3435_v7 }
  0x7c PF: > { %v3604_v8 = vld [vmem:[#allocation2 + $0x13c] ss:$136 sps:$4 sm:$0xff]   ;;  %v3606_v25 = vld [vmem:[#allocation2 + $0x138] ss:$136 sps:$4 sm:$0xff]   ;;  %v3607_v13 = vld [vmem:[#allocation2 + $0x3ec] ss:$-344 sps:$4 sm:$0xff]  }
  0x7d   : > { %v2103_v9 = vld [vmem:[#allocation2 + $0x58] sm:$0xff]  ;;  %2779 = vmatprep.subr.bf16.mxu0 %v3604_v8  ;;  %v2099_v14 = vld [vmem:[#allocation2 + $0x1b0] sm:$0xff]  ;;  %v3789_v15 = vmov 0   ;;  %v2091_v17 = vld [vmem:[#allocation2 + $0x288] sm:$0xff]  ;;  %s3564_s25 = sshll.u32 %s3231_s15, 9  ;;  %s3790_s14 = smov 1  }
  0x7e   : > { %v2105_v11 = vld [vmem:[#allocation2 + $0x198] sm:$0xff]  ;;  %2780 = vmatpush1.bf16.msra.mxu0 %v3606_v25  ;;  %v2101_v16 = vld [vmem:[#allocation2 + $0x2d0] sm:$0xff]  ;;  %3602 = vset.pattern.permute.xlu0 %v3789_v15  ;;  %v2093_v27 = vld [vmem:[#allocation2 + $0x3c8] sm:$0xff]  ;;  %vm3162_vm9 = vcmask 7168  }
  0x7f   : > { %v3529_v12 = vcombine.high %v2103_v9, %v2105_v11  ;;  %v3528_v10 = vcombine.low %v2103_v9, %v2105_v11  ;;  %v3609_v18 = vld [vmem:[#allocation2 + $0x3e8] ss:$-344 sps:$4 sm:$0xff]   ;;  %2781 = vmatprep.subr.bf16.mxu0 %v3607_v13  ;;  %v3525_v19 = vcombine.high %v2099_v14, %v2101_v16  ;;  %v3610_v24 = vld [vmem:[#allocation2 + $0x84] ss:$312 sps:$4 sm:$0xff]   ;;  %v3524_v20 = vcombine.low %v2099_v14, %v2101_v16  ;;  %v3614_v22 = vld [vmem:[#allocation2 + $0x80] ss:$312 sps:$4 sm:$0xff]  }
  0x80   : > { %v3612_v21 = vld [vmem:[#allocation2 + $0x2cc] ss:$272 sps:$4 sm:$0xff]   ;;  %3603 = vset.pattern.permute.xlu1 %v3789_v15  ;;  %v3615_v28 = vld [vmem:[#allocation2 + $0x2c8] ss:$272 sps:$4 sm:$0xff]   ;;  %v3517_v29 = vcombine.high %v2091_v17, %v2093_v27  ;;  %v3516_v32 = vcombine.low %v2091_v17, %v2093_v27  ;;  %v2015_v37 = vld [vmem:[#allocation2 + $0x50] sm:$0xff] }
  0x81   : > { %2822 = vmatprep.subr.bf16.mxu1 %v3529_v12  ;;  %v3616_v26 = vld [vmem:[#allocation2 + $0x2e4] ss:$88 sps:$4 sm:$0xff]   ;;  %v3618_v30 = vld [vmem:[#allocation2 + $0x2e0] ss:$88 sps:$4 sm:$0xff]   ;;  %v2017_v38 = vld [vmem:[#allocation2 + $0x330] sm:$0xff] }
  0x82   : > { %2823 = vmatpush1.bf16.msra.mxu1 %v3528_v10  ;;  %2782 = vmatpush1.bf16.msra.mxu0 %v3609_v18  ;;  %v3619_v31 = vld [vmem:[#allocation2 + $0x324] ss:$-536 sps:$4 sm:$0xff]   ;;  %v3623_v34 = vld [vmem:[#allocation2 + $0x320] ss:$-536 sps:$4 sm:$0xff]   ;;  %v3441_v41 = vcombine.high %v2015_v37, %v2017_v38  ;;  %v3440_v44 = vcombine.low %v2015_v37, %v2017_v38  ;;  %v3634_v45 = vld [vmem:[#allocation2 + $0x2b4] ss:$-472 sps:$4 sm:$0xff]  }
  0x83   : > { %2824 = vmatprep.subr.bf16.mxu1 %v3525_v19  ;;  %2783 = vmatprep.subr.bf16.mxu0 %v3610_v24  ;;  %v3621_v33 = vld [vmem:[#allocation2 + $0x24c] ss:$-552 sps:$4 sm:$0xff]   ;;  %v3624_v35 = vld [vmem:[#allocation2 + $0x248] ss:$-552 sps:$4 sm:$0xff]   ;;  %v3636_v47 = vld [vmem:[#allocation2 + $0x134] ss:$488 sps:$4 sm:$0xff]  }
  0x84   : > { %v3625_v36 = vld [vmem:[#allocation2 + $0x384] ss:$-616 sps:$4 sm:$0xff]   ;;  %v3629_v40 = vld [vmem:[#allocation2 + $0x380] ss:$-616 sps:$4 sm:$0xff]   ;;  %v2131_v53 = vld [vmem:[#allocation2 + $0x148] sm:$0xff] }
  0x85   : > { %v3627_v39 = vld [vmem:[#allocation2 + $0x32c] ss:$144 sps:$4 sm:$0xff]   ;;  %v3630_v42 = vld [vmem:[#allocation2 + $0x328] ss:$144 sps:$4 sm:$0xff]   ;;  %v3631_v43 = vld [vmem:[#allocation2 + $0x74] ss:$112 sps:$4 sm:$0xff]  }
  0x86   : > { %2825 = vmatpush1.bf16.msra.mxu1 %v3524_v20  ;;  %2784 = vmatpush1.bf16.msra.mxu0 %v3614_v22  ;;  %v3633_v46 = vld [vmem:[#allocation2 + $0x70] ss:$112 sps:$4 sm:$0xff]   ;;  %v3640_v49 = vld [vmem:[#allocation2 + $0x1dc] ss:$-152 sps:$4 sm:$0xff]   ;;  %v2133_v55 = vld [vmem:[#allocation2 + $0x68] sm:$0xff] }
  0x87   : > { %2826 = vmatprep.subr.bf16.mxu1 %v3612_v21  ;;  %2785 = vmatprep.subr.bf16.mxu0 %v3616_v26  ;;  %v3638_v48 = vld [vmem:[#allocation2 + $0x2b0] ss:$-472 sps:$4 sm:$0xff]   ;;  %v3642_v51 = vld [vmem:[#allocation2 + $0x29c] ss:$120 sps:$4 sm:$0xff]   ;;  %v2063_v57 = vld [vmem:[#allocation2 + $0x208] sm:$0xff]  ;;  %v3557_v59 = vcombine.high %v2131_v53, %v2133_v55  ;;  %v3556_v3 = vcombine.low %v2131_v53, %v2133_v55 }
  0x88   : > { %v3639_v50 = vld [vmem:[#allocation2 + $0x130] ss:$488 sps:$4 sm:$0xff]   ;;  %v3646_v56 = vld [vmem:[#allocation2 + $0x35c] ss:$-8 sps:$4 sm:$0xff]   ;;  %v2065_v58 = vld [vmem:[#allocation2 + $0x88] sm:$0xff] }
  0x89   : > { %v3644_v52 = vld [vmem:[#allocation2 + $0x1d8] ss:$-152 sps:$4 sm:$0xff]   ;;  %v3489_v63 = vcombine.high %v2063_v57, %v2065_v58  ;;  %v4187_v1 = vld [vmem:[%s3863_s11 + $0x18] sm:$0xff]  ;;  %v2059_v23 = vld [vmem:[#allocation2 + $0x230] sm:$0xff]  ;;  %v3488_v7 = vcombine.low %v2063_v57, %v2065_v58 }
  0x8a   : > { %2827 = vmatpush1.bf16.msra.mxu1 %v3615_v28  ;;  %2786 = vmatpush1.bf16.msra.mxu0 %v3618_v30  ;;  %v3645_v54 = vld [vmem:[#allocation2 + $0x298] ss:$120 sps:$4 sm:$0xff]   ;;  %v4190_v2 = vld [vmem:[%s3863_s11 + $0x38] sm:$0xff]  ;;  %v3652_v12 = vld [vmem:[#allocation2 + $0x7c] ss:$760 sps:$4 sm:$0xff]  }
  0x8b   : > { %2828 = vmatprep.subr.bf16.mxu1 %v3517_v29  ;;  %2787 = vmatprep.subr.bf16.mxu0 %v3619_v31  ;;  %v3648_v60 = vld [vmem:[#allocation2 + $0x358] ss:$-8 sps:$4 sm:$0xff]   ;;  %v4194_v5 = vpack.c.bf16 %v4190_v2, %v4187_v1  ;;  %v3649_v6 = vld [vmem:[#allocation2 + $0x27c] ss:$-80 sps:$4 sm:$0xff]   ;;  %v2051_v18 = vld [vmem:[#allocation2 + $0x2a0] sm:$0xff] }
  0x8c   : > { %v4177_v61 = vld [vmem:[%s3863_s11 + $0x8] sm:$0xff]  ;;  %v2061_v4 = vld [vmem:[#allocation2 + $0x90] sm:$0xff]  ;;  %v2053_v19 = vld [vmem:[#allocation2 + $0xa0] sm:$0xff] }
  0x8d   : > { %v4180_v62 = vld [vmem:[%s3863_s11 + $0x28] sm:$0xff]  ;;  %2854 = vmatprep.mubr.bf16.mxu1 %v4194_v5  ;;  %v3485_v9 = vcombine.high %v2059_v23, %v2061_v4  ;;  %v2055_v11 = vld [vmem:[#allocation2 + $0xb0] sm:$0xff]  ;;  %v3484_v10 = vcombine.low %v2059_v23, %v2061_v4  ;;  %v3477_v21 = vcombine.high %v2051_v18, %v2053_v19  ;;  %v3476_v26 = vcombine.low %v2051_v18, %v2053_v19  ;;  %v3679_v23 = vld [vmem:[#allocation2 + $0x388] ss:$-72 sps:$4 sm:$0xff]  }
  0x8e   : > { %2829 = vmatpush1.bf16.msra.mxu1 %v3516_v32  ;;  %2788 = vmatpush1.bf16.msra.mxu0 %v3623_v34  ;;  %v4184_v0 = vpack.c.bf16 %v4180_v62, %v4177_v61  ;;  %v3651_v8 = vld [vmem:[#allocation2 + $0x278] ss:$-80 sps:$4 sm:$0xff]   ;;  %v2057_v25 = vld [vmem:[#allocation2 + $0x1f0] sm:$0xff]  ;;  %v3658_v27 = vld [vmem:[#allocation2 + $0x21c] ss:$-528 sps:$4 sm:$0xff]  }
  0x8f   : > { %2830 = vmatprep.subr.bf16.mxu1 %v3621_v33  ;;  %2789 = vmatprep.subr.bf16.mxu0 %v3625_v36  ;;  %v3654_v13 = vld [vmem:[#allocation2 + $0x78] ss:$760 sps:$4 sm:$0xff]   ;;  %v3481_v14 = vcombine.high %v2055_v11, %v2057_v25  ;;  %v3655_v16 = vld [vmem:[#allocation2 + $0x254] ss:$-408 sps:$4 sm:$0xff]   ;;  %v3480_v20 = vcombine.low %v2055_v11, %v2057_v25  ;;  %v2042_v36 = vld [vmem:[#allocation2 + $0x280] sm:$0xff] }
  0x90   : > { %2811 = vmatprep.mubr.bf16.mxu0 %v4184_v0  ;;  %v2115_v24 = vld [vmem:[#allocation2 + $0xf0] sm:$0xff]  ;;  %v3660_v29 = vld [vmem:[#allocation2 + $0x1a4] ss:$184 sps:$4 sm:$0xff]   ;;  %v3662_v30 = vld [vmem:[#allocation2 + $0x218] ss:$-528 sps:$4 sm:$0xff]  }
  0x91   : > { %v2117_v15 = vld [vmem:[#allocation2 + $0x170] sm:$0xff]  ;;  %v2107_v31 = vld [vmem:[#allocation2 + $0x1f8] sm:$0xff]  ;;  %v4228_v4 = vld [vmem:[#allocation3 + $0x8] sm:$0xff] }
  0x92   : > { %2831 = vmatpush1.bf16.msra.mxu1 %v3624_v35  ;;  %2790 = vmatpush1.bf16.msra.mxu0 %v3629_v40  ;;  %v3657_v22 = vld [vmem:[#allocation2 + $0x250] ss:$-408 sps:$4 sm:$0xff]   ;;  %v3541_v17 = vcombine.high %v2115_v24, %v2117_v15  ;;  %v3540_v28 = vcombine.low %v2115_v24, %v2117_v15  ;;  %v3664_v34 = vld [vmem:[#allocation2 + $0x104] ss:$88 sps:$4 sm:$0xff]   ;;  %v3675_v53 = vld [vmem:[#allocation2 + $0x1cc] ss:$8 sps:$4 sm:$0xff]  }
  0x93   : > { %2832 = vmatprep.subr.bf16.mxu1 %v3627_v39  ;;  %2791 = vmatprep.subr.bf16.mxu0 %v3441_v41  ;;  %v2109_v32 = vld [vmem:[#allocation2 + $0x398] sm:$0xff]  ;;  %v2040_v35 = vld [vmem:[#allocation2 + $0xc0] sm:$0xff]  ;;  %v4199_v39 = vld [vmem:[%s3863_s11] sm:$0xff] }
  0x94   : > { %v3663_v33 = vld [vmem:[#allocation2 + $0x1a0] ss:$184 sps:$4 sm:$0xff]   ;;  %v3533_v37 = vcombine.high %v2107_v31, %v2109_v32  ;;  %v4202_v40 = vld [vmem:[%s3863_s11 + $0x20] sm:$0xff]  ;;  %v3699_v19 = vld [vmem:[#allocation2 + $0x304] ss:$-392 sps:$4 sm:$0xff]  }
  0x95   : > { %v3666_v38 = vld [vmem:[#allocation2 + $0x100] ss:$88 sps:$4 sm:$0xff]   ;;  %v3678_v57 = vld [vmem:[#allocation2 + $0x214] ss:$-40 sps:$4 sm:$0xff]  }
  0x96   : > { %2833 = vmatpush1.bf16.msra.mxu1 %v3630_v42  ;;  %2792 = vmatpush1.bf16.msra.mxu0 %v3440_v44  ;;  %v4205_v41 = vld [vmem:[%s3863_s11 + $0x10] sm:$0xff]  ;;  %v3467_v42 = vcombine.high %v2040_v35, %v2042_v36  ;;  %v3693_v11 = vld [vmem:[#allocation2 + $0x114] ss:$-120 sps:$4 sm:$0xff]  }
  0x97   : > { %2834 = vmatprep.subr.bf16.mxu1 %v3631_v43  ;;  %2793 = vmatprep.subr.bf16.mxu0 %v3634_v45  ;;  %v3532_v43 = vcombine.low %v2107_v31, %v2109_v32  ;;  %v4208_v44 = vld [vmem:[%s3863_s11 + $0x30] sm:$0xff]  ;;  %v4212_v45 = vpack.c.bf16 %v4202_v40, %v4199_v39  ;;  %v2068_v31 = vld [vmem:[#allocation2 + $0x268] sm:$0xff] }
  0x98   : > { %v3688_v25 = vld [vmem:[#allocation2 + $0x40] ss:$168 sps:$4 sm:$0xff]  }
  0x99   : > { %v3694_v18 = vld [vmem:[#allocation2 + $0x260] ss:$88 sps:$4 sm:$0xff]   ;;  %v2070_v32 = vld [vmem:[#allocation2 + $0x188] sm:$0xff] }
  0x9a   : > { %2835 = vmatpush1.bf16.msra.mxu1 %v3633_v46  ;;  %2794 = vmatpush1.bf16.msra.mxu0 %v3638_v48  ;;  %v3669_v46 = vld [vmem:[#allocation2 + $0x124] ss:$456 sps:$4 sm:$0xff]   ;;  %v4216_v48 = vpack.c.bf16 %v4208_v44, %v4205_v41 }
  0x9b   : > { %2836 = vmatprep.subr.bf16.mxu1 %v3636_v47  ;;  %2795 = vmatprep.subr.bf16.mxu0 %v3640_v49  ;;  %v3466_v47 = vcombine.low %v2040_v35, %v2042_v36  ;;  %v3672_v49 = vld [vmem:[#allocation2 + $0x2fc] ss:$-720 sps:$4 sm:$0xff]   ;;  %v2078_v15 = vld [vmem:[#allocation2 + $0x220] sm:$0xff]  ;;  %v3495_v35 = vcombine.high %v2068_v31, %v2070_v32 }
  0x9e   : > { %2837 = vmatpush1.bf16.msra.mxu1 %v3639_v50  ;;  %2796 = vmatpush2.bf16.msra.mxu0 %v3644_v52  ;;  %v3667_v50 = vld [vmem:[#allocation2 + $0x120] ss:$456 sps:$4 sm:$0xff]  }
  0x9f   : > { %2838 = vmatprep.subr.bf16.mxu1 %v3642_v51  ;;  %2797 = vmatprep.subr.bf16.mxu0 %v3646_v56  ;;  %v2032_v51 = vld [vmem:[#allocation2 + $0x1a8] sm:$0xff] }
  0xa0   : > { %v2034_v52 = vld [vmem:[#allocation2 + $0x168] sm:$0xff] }
  0xa1   : > { %v3459_v55 = vcombine.high %v2032_v51, %v2034_v52  ;;  %v3673_v56 = vld [vmem:[#allocation2 + $0x1c8] ss:$8 sps:$4 sm:$0xff]   ;;  %v3458_v58 = vcombine.low %v2032_v51, %v2034_v52  ;;  %v3711_v51 = vld [vmem:[#allocation2 + $0x364] ss:$-24 sps:$4 sm:$0xff]  }
  0xa2   : > { %2839 = vmatpush2.bf16.msra.mxu1 %v3645_v54  ;;  %2798 = vmatpush2.bf16.msra.mxu0 %v3648_v60  ;;  %v3670_v54 = vld [vmem:[#allocation2 + $0x2f8] ss:$-720 sps:$4 sm:$0xff]  }
  0xa3   : > { %2840 = vmatprep.subr.bf16.mxu1 %v3557_v59  ;;  %2799 = vmatprep.subr.bf16.mxu0 %v3489_v63  ;;  %v3681_v59 = vld [vmem:[#allocation2 + $0x38c] ss:$-72 sps:$4 sm:$0xff]   ;;  %v3676_v60 = vld [vmem:[#allocation2 + $0x210] ss:$-40 sps:$4 sm:$0xff]  }
  0xa4   : > { %v4222_v63 = vld [vmem:[#allocation3] sm:$0xff] }
  0xa5   : > { %2955 = vperm.xlu0 %3602, %v4222_v63  }
  0xa6   : > { %2841 = vmatpush2.bf16.msra.mxu1 %v3556_v3  ;;  %2800 = vmatpush2.bf16.msra.mxu0 %v3488_v7  ;;  %v3684_v3 = vld [vmem:[#allocation2 + $0x3ac] ss:$-584 sps:$4 sm:$0xff]   ;;  %v3682_v7 = vld [vmem:[#allocation2 + $0x3a8] ss:$-584 sps:$4 sm:$0xff]  }
  0xa7   : > { %2842 = vmatprep.subr.bf16.mxu1 %v3649_v6  ;;  %2801 = vmatprep.subr.bf16.mxu0 %v3485_v9  ;;  %v2006_v6 = vld [vmem:[%s4443_s0 + $0x8] sm:$0xff]  ;;  %v3685_v9 = vld [vmem:[#allocation2 + $0x150] ss:$-240 sps:$4 sm:$0xff]  }
  0xa9   : > { %2960 = vperm.xlu0 %3602, %v4228_v4  }
  0xaa   : > { %2843 = vmatpush2.bf16.msra.mxu1 %v3651_v8  ;;  %2802 = vmatpush2.bf16.msra.mxu0 %v3484_v10  ;;  %v3690_v8 = vld [vmem:[#allocation2 + $0x44] ss:$168 sps:$4 sm:$0xff]  }
  0xab   : > { %2844 = vmatprep.subr.bf16.mxu1 %v3652_v12  ;;  %2803 = vmatprep.subr.bf16.mxu0 %v3481_v14  ;;  %v2016_v12 = vld [vmem:[#allocation2 + $0x368] sm:$0xff]  ;;  %v3691_v14 = vld [vmem:[#allocation2 + $0x110] ss:$-120 sps:$4 sm:$0xff]  }
  0xac   : > { %v2018_v10 = vld [vmem:[#allocation2 + $0x48] sm:$0xff] }
  0xad   : > { %v3442_v24 = vcombine.low %v2016_v12, %v2018_v10 }
  0xae   : > { %2845 = vmatpush2.bf16.msra.mxu1 %v3654_v13  ;;  %2804 = vmatpush2.bf16.msra.mxu0 %v3480_v20  ;;  %v3696_v13 = vld [vmem:[#allocation2 + $0x264] ss:$88 sps:$4 sm:$0xff]  }
  0xaf   : > { %2846 = vmatprep.subr.bf16.mxu1 %v3655_v16  ;;  %2805 = vmatprep.subr.bf16.mxu0 %v3477_v21  ;;  %v3443_v16 = vcombine.high %v2016_v12, %v2018_v10  ;;  %v2076_v20 = vld [vmem:[#allocation2 + $0x200] sm:$0xff]  ;;  %v3702_v21 = vld [vmem:[#allocation2 + $0x3b4] ss:$-920 sps:$4 sm:$0xff]  }
  0xb0   : > { %v2044_v12 = vld [vmem:[#allocation2 + $0x3c0] sm:$0xff] }
  0xb1   : > { %v2046_v10 = vld [vmem:[#allocation2 + $0x3e0] sm:$0xff] }
  0xb2   : > { %2847 = vmatpush2.bf16.msra.mxu1 %v3657_v22  ;;  %2806 = vmatpush2.bf16.msra.mxu0 %v3476_v26  ;;  %v3697_v22 = vld [vmem:[#allocation2 + $0x300] ss:$-392 sps:$4 sm:$0xff]  }
  0xb3   : > { %2848 = vmatprep.subr.bf16.mxu1 %v3541_v17  ;;  %2807 = vmatprep.subr.bf16.mxu0 %v3658_v27  ;;  %v3503_v17 = vcombine.high %v2076_v20, %v2078_v15  ;;  %v3700_v26 = vld [vmem:[#allocation2 + $0x3b0] ss:$-920 sps:$4 sm:$0xff]  }
  0xb4   : > { %v2136_v27 = vld [vmem:[#allocation2 + $0x270] sm:$0xff] }
  0xb6   : > { %2849 = vmatpush2.bf16.msra.mxu1 %v3540_v28  ;;  %2808 = vmatpush2.bf16.msra.mxu0 %v3662_v30  ;;  %v2138_v28 = vld [vmem:[#allocation2 + $0x190] sm:$0xff]  ;;  %v3502_v30 = vcombine.low %v2076_v20, %v2078_v15  ;;  %v2971_v15 = vlaneseq }
  0xb7   : > { %2850 = vmatprep.subr.bf16.mxu1 %v3660_v29  ;;  %2809 = vmatprep.subr.bf16.mxu0 %v3664_v34  ;;  %v3705_v29 = vld [vmem:[#allocation2 + $0x34] ss:$632 sps:$4 sm:$0xff]   ;;  %v3703_v34 = vld [vmem:[#allocation2 + $0x30] ss:$632 sps:$4 sm:$0xff]   ;;  %v3562_v36 = vcombine.low %v2136_v27, %v2138_v28 }
  0xb8   : > { %v3727_v20 = vld [vmem:[#allocation2 + $0x238] ss:$344 sps:$4 sm:$0xff]  }
  0xba   : > { %2851 = vmatpush2.bf16.msra.mxu1 %v3663_v33  ;;  %2810 = vmatpush2.bf16.msra.mxu0 %v3666_v38  ;;  %v3563_v33 = vcombine.high %v2136_v27, %v2138_v28  ;;  %v2066_v38 = vld [vmem:[#allocation2 + $0x2f0] sm:$0xff]  ;;  %v2977_v27 = vstv %s3564_s25 }
  0xbb   : > { %2852 = vmatprep.subr.bf16.mxu1 %v3533_v37  ;;  %2865 = vmatprep.subr.bf16.mxu0 %v3467_v42  ;;  %v2064_v37 = vld [vmem:[#allocation2 + $0xd0] sm:$0xff]  ;;  %v3708_v42 = vld [vmem:[#allocation2 + $0xfc] ss:$-248 sps:$4 sm:$0xff]  }
  0xbc   : > { %v3490_v52 = vcombine.low %v2064_v37, %v2066_v38 }
  0xbd   : > { %2812 = vmatmul.mubr.bf16.vlgmr.msra.gmra.mxu0 %v4212_v45 }
  0xbe   : > { %2853 = vmatpush2.bf16.msra.mxu1 %v3532_v43  ;;  %2866 = vmatpush1.bf16.msra.mxu0 %v3466_v47  ;;  %v3494_v43 = vcombine.low %v2068_v31, %v2070_v32  ;;  %v3706_v47 = vld [vmem:[#allocation2 + $0xf8] ss:$-248 sps:$4 sm:$0xff]  }
  0xbf   : > { %2908 = vmatprep.subr.bf16.mxu1 %v3669_v46  ;;  %2897 = vmatprep.mubr.bf16.mxu0 %v4184_v0  ;;  %v2005_v0 = vld [vmem:[%s4443_s0] sm:$0xff]  ;;  %v3491_v46 = vcombine.high %v2064_v37, %v2066_v38 }
  0xc0   : > { %2867 = vmatprep.subr.bf16.mxu0 %v3672_v49  ;;  %2992 = vperm.xlu1 %3603, %v2005_v0   ;;  %v2060_v49 = vld [vmem:[#allocation2 + $0x240] sm:$0xff] }
  0xc1   : > { %2855 = vmatmul.mubr.bf16.vlgmr.msra.gmra.mxu1 %v4216_v48  ;;  %v3714_v0 = vld [vmem:[#allocation2 + $0x1e4] ss:$-464 sps:$4 sm:$0xff]  }
  0xc2   : > { %2909 = vmatpush1.bf16.msra.mxu1 %v3667_v50  ;;  %2940 = vmatprep.mubr.bf16.mxu1 %v4194_v5  ;;  %v3687_v5 = vld [vmem:[#allocation2 + $0x154] ss:$-240 sps:$4 sm:$0xff]  }
  0xc3   : > { %2910 = vmatprep.subr.bf16.mxu1 %v3675_v53  ;;  %2868 = vmatpush1.bf16.msra.mxu0 %v3670_v54  ;;  %v2062_v50 = vld [vmem:[#allocation2 + $0x3a0] sm:$0xff]  ;;  %v2124_v53 = vld [vmem:[#allocation2 + $0x308] sm:$0xff] }
  0xc4   : > { %2869 = vmatprep.subr.bf16.mxu0 %v3459_v55  ;;  %2997 = vperm.xlu1 %3603, %v2006_v6   ;;  %v2126_v54 = vld [vmem:[#allocation2 + $0xc8] sm:$0xff]  ;;  %v3487_v55 = vcombine.high %v2060_v49, %v2062_v50  ;;  %v3717_v6 = vld [vmem:[#allocation2 + $0x3f4] ss:$-304 sps:$4 sm:$0xff]  }
  0xc6   : > { %2911 = vmatpush1.bf16.msra.mxu1 %v3673_v56  ;;  %v3709_v56 = vld [vmem:[#allocation2 + $0x360] ss:$-24 sps:$4 sm:$0xff]  }
  0xc7   : > { %2912 = vmatprep.subr.bf16.mxu1 %v3678_v57  ;;  %2870 = vmatpush1.bf16.msra.mxu0 %v3458_v58  ;;  %v3551_v57 = vcombine.high %v2124_v53, %v2126_v54  ;;  %v3486_v58 = vcombine.low %v2060_v49, %v2062_v50 }
  0xc8   : > { %2871 = vmatprep.subr.bf16.mxu0 %v3681_v59  ;;  %v2120_v59 = vld [vmem:[#allocation2 + $0x378] sm:$0xff] }
  0xca   : > { %2913 = vmatpush1.bf16.msra.mxu1 %v3676_v60  ;;  %v2122_v60 = vld [vmem:[#allocation2 + $0x38] sm:$0xff] }
  0xcb   : > { %2914 = vmatprep.subr.bf16.mxu1 %v3684_v3  ;;  %2872 = vmatpush1.bf16.msra.mxu0 %v3679_v23  ;;  %v3550_v3 = vcombine.low %v2124_v53, %v2126_v54  ;;  %v3547_v23 = vcombine.high %v2120_v59, %v2122_v60 }
  0xcc   : > { %2873 = vmatprep.subr.bf16.mxu0 %v3687_v5  ;;  %v3712_v5 = vld [vmem:[#allocation2 + $0x1e0] ss:$-464 sps:$4 sm:$0xff]  }
  0xce   : > { %2915 = vmatpush1.bf16.msra.mxu1 %v3682_v7  ;;  %v3546_v7 = vcombine.low %v2120_v59, %v2122_v60 }
  0xcf   : > { %2916 = vmatprep.subr.bf16.mxu1 %v3690_v8  ;;  %2874 = vmatpush1.bf16.msra.mxu0 %v3685_v9  ;;  %v3720_v8 = vld [vmem:[#allocation2 + $0x184] ss:$592 sps:$4 sm:$0xff]   ;;  %v3715_v9 = vld [vmem:[#allocation2 + $0x3f0] ss:$-304 sps:$4 sm:$0xff]  }
  0xd0   : > { %2875 = vmatprep.subr.bf16.mxu0 %v3693_v11  ;;  %v3723_v11 = vld [vmem:[#allocation2 + $0x3fc] ss:$-720 sps:$4 sm:$0xff]  }
  0xd2   : > { %2917 = vmatpush1.bf16.msra.mxu1 %v3688_v25  ;;  %v3718_v25 = vld [vmem:[#allocation2 + $0x180] ss:$592 sps:$4 sm:$0xff]  }
  0xd3   : > { %2918 = vmatprep.subr.bf16.mxu1 %v3696_v13  ;;  %2876 = vmatpush1.bf16.msra.mxu0 %v3691_v14  ;;  %v3726_v13 = vld [vmem:[#allocation2 + $0xac] ss:$560 sps:$4 sm:$0xff]   ;;  %v3721_v14 = vld [vmem:[#allocation2 + $0x3f8] ss:$-720 sps:$4 sm:$0xff]  }
  0xd4   : > { %2877 = vmatprep.subr.bf16.mxu0 %v3443_v16  ;;  %v3471_v16 = vcombine.high %v2044_v12, %v2046_v10 }
  0xd6   : > { %2919 = vmatpush1.bf16.msra.mxu1 %v3694_v18  ;;  %v3724_v18 = vld [vmem:[#allocation2 + $0xa8] ss:$560 sps:$4 sm:$0xff]  }
  0xd7   : > { %2920 = vmatprep.subr.bf16.mxu1 %v3699_v19  ;;  %2878 = vmatpush1.bf16.msra.mxu0 %v3442_v24  ;;  %v3729_v19 = vld [vmem:[#allocation2 + $0x23c] ss:$344 sps:$4 sm:$0xff]   ;;  %v3470_v24 = vcombine.low %v2044_v12, %v2046_v10 }
  0xd8   : > { %2879 = vmatprep.subr.bf16.mxu0 %v3702_v21  ;;  %v2972_v21 = vand.u32 127, %v2971_v15 }
  0xda   : > { %2921 = vmatpush1.bf16.msra.mxu1 %v3697_v22  ;;  %v2973_v22 = vadd.s32 128, %v2972_v21 }
  0xdb   : > { %2922 = vmatprep.subr.bf16.mxu1 %v3503_v17  ;;  %2880 = vmatpush1.bf16.msra.mxu0 %v3700_v26 }
  0xdc   : > { %2881 = vmatprep.subr.bf16.mxu0 %v3705_v29  ;;  %v2979_v28 = vadd.s32 %v2977_v27, %v2973_v22  ;;  %v2978_v29 = vadd.s32 %v2977_v27, %v2972_v21 }
  0xde   : > { %2923 = vmatpush1.bf16.msra.mxu1 %v3502_v30  ;;  %v2983_v32 = vadd.s32 1, %v2979_v28 }
  0xdf   : > { %2924 = vmatprep.subr.bf16.mxu1 %v3563_v33  ;;  %2882 = vmatpush2.bf16.msra.mxu0 %v3703_v34  ;;  %v2982_v33 = vadd.s32 1, %v2978_v29 }
  0xe0   : > { %2883 = vmatprep.subr.bf16.mxu0 %v3495_v35 }
  0xe2   : > { %2925 = vmatpush2.bf16.msra.mxu1 %v3562_v36 }
  0xe3   : > { %2926 = vmatprep.subr.bf16.mxu1 %v3708_v42  ;;  %2884 = vmatpush2.bf16.msra.mxu0 %v3494_v43 }
  0xe4   : > { %2885 = vmatprep.subr.bf16.mxu0 %v3491_v46 }
  0xe6   : > { %2927 = vmatpush2.bf16.msra.mxu1 %v3706_v47 }
  0xe7   : > { %2928 = vmatprep.subr.bf16.mxu1 %v3711_v51  ;;  %2886 = vmatpush2.bf16.msra.mxu0 %v3490_v52 }
  0xe8   : > { %2887 = vmatprep.subr.bf16.mxu0 %v3487_v55 }
  0xea   : > { %2929 = vmatpush2.bf16.msra.mxu1 %v3709_v56  ;;  %v2974_v56 = vadd.s32 256, %v2972_v21 }
  0xeb   : > { %2930 = vmatprep.subr.bf16.mxu1 %v3551_v57  ;;  %2888 = vmatpush2.bf16.msra.mxu0 %v3486_v58 }
  0xec   : > { %2889 = vmatprep.subr.bf16.mxu0 %v3714_v0 }
  0xee   : > { %2931 = vmatpush2.bf16.msra.mxu1 %v3550_v3  ;;  %v2975_v3 = vadd.s32 384, %v2972_v21 }
  0xef   : > { %2932 = vmatprep.subr.bf16.mxu1 %v3547_v23  ;;  %2890 = vmatpush2.bf16.msra.mxu0 %v3712_v5  ;;  %v2980_v23 = vadd.s32 %v2977_v27, %v2974_v56 }
  0xf0   : > { %2891 = vmatprep.subr.bf16.mxu0 %v3717_v6 }
  0xf1   : > { %v2984_v12 = vadd.s32 1, %v2980_v23 }
  0xf2   : > { %2933 = vmatpush2.bf16.msra.mxu1 %v3546_v7 }
  0xf3   : > { %2934 = vmatprep.subr.bf16.mxu1 %v3720_v8  ;;  %2892 = vmatpush2.bf16.msra.mxu0 %v3715_v9  ;;  %v2981_v9 = vadd.s32 %v2977_v27, %v2975_v3 }
  0xf4   : > { %2893 = vmatprep.subr.bf16.mxu0 %v3723_v11 }
  0xf6   : > { %2935 = vmatpush2.bf16.msra.mxu1 %v3718_v25 }
  0xf7   : > { %2936 = vmatprep.subr.bf16.mxu1 %v3726_v13  ;;  %2894 = vmatpush2.bf16.msra.mxu0 %v3721_v14 }
  0xf8   : > { %2895 = vmatprep.subr.bf16.mxu0 %v3471_v16  ;;  %v2985_v16 = vadd.s32 1, %v2981_v9 }
  0xfa   : > { %2937 = vmatpush2.bf16.msra.mxu1 %v3724_v18 }
  0xfb   : > { %2938 = vmatprep.subr.bf16.mxu1 %v3729_v19  ;;  %2896 = vmatpush2.bf16.msra.mxu0 %v3470_v24 }
  0xfe   : > { %2939 = vmatpush2.bf16.msra.mxu1 %v3727_v20  ;;  %2898 = vmatmul.mubr.bf16.vlgmr.msra.gmra.mxu0 %v4212_v45  ;;  %v2987_v45 = vcvt.s32.f32 %v2983_v32 }
 0x100   : > { %v3566_v47 = vadd.f32 -1.0, %v2987_v45 }
 0x101   : > { %2941 = vmatmul.mubr.bf16.vlgmr.msra.gmra.mxu1 %v4216_v48  ;;  %v2986_v48 = vcvt.s32.f32 %v2982_v33 }
 0x103   : > { %v3565_v52 = vadd.f32 -1.0, %v2986_v48 }
 0x120   : > { %v4238_v38 = vpop.permute.xlu0 %2955 }
 0x124   : > { %v4252_v55 = vpop.permute.xlu0 %2960 }
 0x13b   : > { %v4246_v50 = vpop.permute.xlu1 %2992 }
 0x13c   : > { %v3061_v57 = vadd.f32 %v3566_v47, %v4246_v50  ;;  %v3060_v60 = vadd.f32 %v3565_v52, %v4246_v50 }
 0x17d   : > { %v2813_v17 = vpop.f32.mrf.mxu0 }
 0x17f   : > { %v2815_v30 = vpop.f32.mrf.mxu0 }
 0x181   : > { %v2856_v26 = vpop.f32.mrf.mxu1  ;;  %v2817_v34 = vpop.f32.mrf.mxu0 }
 0x182   : > { %v2857_v37 = vadd.f32 %v2856_v26, %v2813_v17  ;;  %v4299_v17 = vcvt.s32.f32 %v2985_v16 }
 0x183   : > { %v2858_v31 = vpop.f32.mrf.mxu1  ;;  %v2819_v42 = vpop.f32.mrf.mxu0 }
 0x184   : > { %v2859_v36 = vadd.f32 %v2858_v31, %v2815_v30  ;;  %v4244_v49 = vadd.f32 %v4238_v38, %v2857_v37 }
 0x185   : > { %v2860_v35 = vpop.f32.mrf.mxu1 }
 0x186   : > { %v4241_v46 = vadd.f32 %v4238_v38, %v2859_v36  ;;  %v2861_v53 = vadd.f32 %v2860_v35, %v2817_v34  ;;  %v4257_v58 = vsub.f32 %v4244_v49, %v4199_v39  ;;  %v3008_v25 = vsub.f32 %v2986_v48, %v4244_v49 }
 0x187   : > { %v2862_v43 = vpop.f32.mrf.mxu1 }
 0x188   : > { %v2863_v51 = vadd.f32 %v2862_v43, %v2819_v42  ;;  %v4250_v54 = vsub.f32 %v4241_v46, %v4177_v61  ;;  %v4264_v0 = vadd.f32 %v4252_v55, %v2861_v53  ;;  %v4266_v61 = vpop.permute.xlu1 %2997  ;;  %v4276_v39 = vsub.f32 %v3060_v60, %v4257_v58 }
 0x189   : > { %v3065_v7 = vadd.f32 %v3566_v47, %v4266_v61  ;;  %v3064_v11 = vadd.f32 %v3565_v52, %v4266_v61  ;;  %v3016_v19 = vadd.f32 %v3008_v25, %v4246_v50 }
 0x18a   : > { %v4260_v59 = vadd.f32 %v4252_v55, %v2863_v51  ;;  %v4269_v5 = vsub.f32 %v3061_v57, %v4250_v54  ;;  %v4281_v8 = vsub.f32 %v4264_v0, %v4202_v40  ;;  %v3092_v13 = vmax.f32 %v4276_v39, 1.0 }
 0x18b   : > { %v2988_v40 = vcvt.s32.f32 %v2984_v12  ;;  %v3012_v24 = vsub.f32 %v2986_v48, %v4264_v0  ;;  %vm3076_vm2 = vcmp.gt.f32.partialorder %v4276_v39, 0.0 }
 0x18c   : > { %v4273_v6 = vsub.f32 %v4260_v59, %v4180_v62  ;;  %v3093_v10 = vmax.f32 %v4269_v5, 1.0  ;;  %v3009_v62 = vsub.f32 %v2987_v45, %v4241_v46  ;;  %v4292_v18 = vsub.f32 %v3064_v11, %v4281_v8 }
 0x18d   : > { %v3013_v15 = vsub.f32 %v2987_v45, %v4260_v59  ;;  %v3567_v28 = vadd.f32 -1.0, %v2988_v40  ;;  %v3020_v31 = vadd.f32 %v3012_v24, %v4266_v61  ;;  %v3568_v45 = vadd.f32 -1.0, %v4299_v17 }
 0x18e   : > { %v4289_v14 = vsub.f32 %v3065_v7, %v4273_v6  ;;  %3730 = vrcp.f32 %v3093_v10  ;;  %v3017_v20 = vadd.f32 %v3009_v62, %v4246_v50  ;;  %v3096_v26 = vmax.f32 %v4292_v18, 1.0 }
 0x18f   : > { %3732 = vrcp.f32 %v3092_v13  ;;  %v3021_v34 = vadd.f32 %v3013_v15, %v4266_v61  ;;  %v3062_v37 = vadd.f32 %v3567_v28, %v4246_v50  ;;  %v3063_v60 = vadd.f32 %v3568_v45, %v4246_v50 }
 0x190   : > { %v3097_v22 = vmax.f32 %v4289_v14, 1.0  ;;  %3734 = vrcp.f32 %v3016_v19  ;;  %v3066_v12 = vadd.f32 %v3567_v28, %v4266_v61  ;;  %v3084_v24 = vsub.f32 %v4246_v50, %v4257_v58 }
 0x191   : > { %3736 = vrcp.f32 %v3017_v20  ;;  %v3001_v28 = vsub.f32 %v4246_v50, %v4241_v46  ;;  %vm3077_vm1 = vcmp.gt.f32.partialorder %v4269_v5, 0.0  ;;  %vm3080_vm3 = vcmp.gt.f32.partialorder %v4292_v18, 0.0 }
 0x192   : > { %3738 = vrcp.f32 %v3097_v22  ;;  %vm3081_vm4 = vcmp.gt.f32.partialorder %v4289_v14, 0.0 }
 0x193   : > { %3740 = vrcp.f32 %v3096_v26 }
 0x194   : > { %3742 = vrcp.f32 %v3020_v31 }
 0x195   : > { %3744 = vrcp.f32 %v3021_v34  ;;  %v3088_v34 = vsub.f32 %v4266_v61, %v4281_v8  ;;  %v3005_v8 = vsub.f32 %v4266_v61, %v4260_v59 }
 0x19b   : > { %v3731_v7 = vpop.eup %3730 }
 0x19c   : > { %v3733_v10 = vpop.eup %3732 }
 0x19d   : > { %v3101_v26 = vmul.f32 %v3733_v10, %v3084_v24 }
 0x1be   : > { %v2899_v21 = vpop.f32.mrf.mxu0 }
 0x1c0   : > { %v2901_v29 = vpop.f32.mrf.mxu0 }
 0x1c1   : > { %v2942_v27 = vpop.f32.mrf.mxu1 }
 0x1c2   : > { %v2943_v30 = vadd.f32 %v2942_v27, %v2899_v21  ;;  %v2903_v33 = vpop.f32.mrf.mxu0 }
 0x1c3   : > { %v2944_v32 = vpop.f32.mrf.mxu1 }
 0x1c4   : > { %v4305_v35 = vadd.f32 %v4238_v38, %v2943_v30  ;;  %v4307_v36 = vadd.f32 %v2944_v32, %v2901_v29  ;;  %v2905_v51 = vpop.f32.mrf.mxu0 }
 0x1c5   : > { %v2946_v48 = vpop.f32.mrf.mxu1 }
 0x1c6   : > { %v3010_v42 = vsub.f32 %v2988_v40, %v4305_v35  ;;  %v4314_v43 = vsub.f32 %v4305_v35, %v4205_v41  ;;  %v4318_v47 = vadd.f32 %v4238_v38, %v4307_v36  ;;  %v2947_v52 = vadd.f32 %v2946_v48, %v2903_v33 }
 0x1c7   : > { %v2948_v53 = vpop.f32.mrf.mxu1 }
 0x1c8   : > { %v3018_v56 = vadd.f32 %v3010_v42, %v4246_v50  ;;  %v4322_v57 = vsub.f32 %v3062_v37, %v4314_v43  ;;  %v3011_v41 = vsub.f32 %v4299_v17, %v4318_v47  ;;  %v4329_v3 = vsub.f32 %v4318_v47, %v4187_v1 }
 0x1c9   : > { %v4332_v38 = vadd.f32 %v4252_v55, %v2947_v52  ;;  %v4334_v23 = vadd.f32 %v2948_v53, %v2905_v51  ;;  %v3085_v1 = vsub.f32 %v4246_v50, %v4250_v54  ;;  %v3735_v54 = vpop.eup %3734  ;;  %v3116_v37 = vsub.f32 1.0, %v3101_v26 }
 0x1ca   : > { %3746 = vrcp.f32 %v3018_v56  ;;  %v3094_v9 = vmax.f32 %v4322_v57, 1.0  ;;  %v3019_v11 = vadd.f32 %v3011_v41, %v4246_v50  ;;  %v4339_v25 = vsub.f32 %v3063_v60, %v4329_v3  ;;  %v3737_v21 = vpop.eup %3736 }
 0x1cb   : > { %v3014_v62 = vsub.f32 %v2988_v40, %v4332_v38  ;;  %v4347_v13 = vsub.f32 %v4332_v38, %v4208_v44  ;;  %v4351_v16 = vadd.f32 %v4252_v55, %v4334_v23  ;;  %v3103_v20 = vmul.f32 %v3731_v7, %v3085_v1  ;;  %v3739_v58 = vpop.eup %3738 }
 0x1cc   : > { %3748 = vrcp.f32 %v3094_v9  ;;  %v3095_v19 = vmax.f32 %v4339_v25, 1.0  ;;  %v3067_v44 = vadd.f32 %v3568_v45, %v4266_v61  ;;  %v3741_v29 = vpop.eup %3740  ;;  %v3027_v33 = vmul.f32 %v3737_v21, %v3001_v28 }
 0x1cd   : > { %3750 = vrcp.f32 %v3019_v11  ;;  %v3022_v15 = vadd.f32 %v3014_v62, %v4266_v61  ;;  %v4358_v40 = vsub.f32 %v3066_v12, %v4347_v13  ;;  %v3015_v55 = vsub.f32 %v4299_v17, %v4351_v16  ;;  %v3743_v45 = vpop.eup %3742  ;;  %v1990_v62 = vld [vmem:[%s3861_s10 + $0x8] sm:$0xff] }
 0x1ce   : > { %3752 = vrcp.f32 %v3095_v19  ;;  %v4365_v22 = vsub.f32 %v4351_v16, %v4190_v2  ;;  %v3117_v32 = vsub.f32 1.0, %v3103_v20  ;;  %v3089_v17 = vsub.f32 %v4266_v61, %v4273_v6  ;;  %v3745_v42 = vpop.eup %3744 }
 0x1cf   : > { %3754 = vrcp.f32 %v3022_v15  ;;  %v3098_v27 = vmax.f32 %v4358_v40, 1.0  ;;  %v3023_v30 = vadd.f32 %v3015_v55, %v4266_v61  ;;  %v3000_v2 = vsub.f32 %v4246_v50, %v4244_v49 }
 0x1d0   : > { %v4372_v31 = vsub.f32 %v3067_v44, %v4365_v22  ;;  %v3111_v48 = vmul.f32 %v3739_v58, %v3089_v17  ;;  %v3004_v6 = vsub.f32 %v4266_v61, %v4264_v0  ;;  %v3109_v52 = vmul.f32 %v3741_v29, %v3088_v34 }
 0x1d1   : > { %3756 = vrcp.f32 %v3098_v27  ;;  %v3025_v51 = vmul.f32 %v3735_v54, %v3000_v2  ;;  %v3125_v49 = vsel %vm3077_vm1, %v3117_v32, 0.0  ;;  %v3041_v53 = vsub.f32 1.0, %v3027_v33 }
 0x1d2   : > { %3758 = vrcp.f32 %v3023_v30  ;;  %v3099_v46 = vmax.f32 %v4372_v31, 1.0  ;;  %v3033_v56 = vmul.f32 %v3743_v45, %v3004_v6  ;;  %v3002_v41 = vsub.f32 %v4246_v50, %v4305_v35  ;;  %v1994_v45 = vld [vmem:[%s3861_s10 + $0x28] sm:$0xff] }
 0x1d3   : > { %v3124_v7 = vsel %vm3076_vm2, %v3116_v37, 0.0  ;;  %v3035_v5 = vmul.f32 %v3745_v42, %v3005_v8  ;;  %v3121_v9 = vsub.f32 1.0, %v3111_v48  ;;  %v3086_v0 = vsub.f32 %v4246_v50, %v4314_v43  ;;  %v1989_v43 = vld [vmem:[%s3861_s10] sm:$0xff]  ;;  %v1992_v42 = vld [vmem:[%s3861_s10 + $0x18] sm:$0xff] }
 0x1d4   : > { %3760 = vrcp.f32 %v3099_v46  ;;  %v3040_v11 = vsub.f32 1.0, %v3025_v51  ;;  %v3135_v12 = vsub.f32 %v3041_v53, %v3125_v49  ;;  %v3120_v1 = vsub.f32 1.0, %v3109_v52  ;;  %v1993_v53 = vld [vmem:[%s3861_s10 + $0x20] sm:$0xff] }
 0x1d5   : > { %v3003_v19 = vsub.f32 %v4246_v50, %v4318_v47  ;;  %v3087_v20 = vsub.f32 %v4246_v50, %v4329_v3  ;;  %v3044_v54 = vsub.f32 1.0, %v3033_v56  ;;  %v3045_v15 = vsub.f32 1.0, %v3035_v5  ;;  %v1991_v3 = vld [vmem:[%s3861_s10 + $0x10] sm:$0xff] }
 0x1d6   : > { %v3134_v24 = vsub.f32 %v3040_v11, %v3124_v7  ;;  %v3129_v44 = vsel %vm3081_vm4, %v3121_v9, 0.0  ;;  %v3143_v18 = vmul.f32 %v3135_v12, %v1990_v62  ;;  %v3128_v58 = vsel %vm3080_vm3, %v3120_v1, 0.0  ;;  %v1995_v9 = vld [vmem:[%s3861_s10 + $0x30] sm:$0xff] }
 0x1d7   : > { %v3747_v60 = vpop.eup %3746  ;;  %v3006_v47 = vsub.f32 %v4266_v61, %v4332_v38  ;;  %vm3078_vm5 = vcmp.gt.f32.partialorder %v4322_v57, 0.0  ;;  %v3090_v50 = vsub.f32 %v4266_v61, %v4347_v13  ;;  %v3139_v32 = vsub.f32 %v3045_v15, %v3129_v44 }
 0x1d8   : > { %v3029_v59 = vmul.f32 %v3747_v60, %v3002_v41  ;;  %v3142_v30 = vmul.f32 %v3134_v24, %v1989_v43  ;;  %v3138_v46 = vsub.f32 %v3044_v54, %v3128_v58  ;;  %v3007_v57 = vsub.f32 %v4266_v61, %v4351_v16  ;;  %v3133_v54 = vld [vmem:[%s4446_s3 + $0x8] sm:$0xff] }
 0x1d9   : > { %v3749_v10 = vpop.eup %3748  ;;  %vm3079_vm6 = vcmp.gt.f32.partialorder %v4339_v25, 0.0  ;;  %v3091_v48 = vsub.f32 %v4266_v61, %v4365_v22  ;;  %v3147_v41 = vmul.f32 %v3139_v32, %v1994_v45  ;;  %vm3082_vm7 = vcmp.gt.f32.partialorder %v4358_v40, 0.0 }
 0x1da   : > { %v3751_v39 = vpop.eup %3750  ;;  %v3105_v35 = vmul.f32 %v3749_v10, %v3086_v0  ;;  %v3042_v28 = vsub.f32 1.0, %v3029_v59  ;;  %v3150_v52 = vadd.f32 %v3143_v18, %v3142_v30  ;;  %v3146_v11 = vmul.f32 %v3138_v46, %v1993_v53  ;;  %v1996_v10 = vld [vmem:[%s3861_s10 + $0x38] sm:$0xff] }
 0x1db   : > { %v3753_v21 = vpop.eup %3752  ;;  %v3031_v55 = vmul.f32 %v3751_v39, %v3003_v19  ;;  %vm3083_vm8 = vcmp.gt.f32.partialorder %v4372_v31, 0.0 }
 0x1dc   : > { %v3118_v26 = vsub.f32 1.0, %v3105_v35  ;;  %v3755_v27 = vpop.eup %3754  ;;  %v3107_v14 = vmul.f32 %v3753_v21, %v3087_v20  ;;  %v3155_v39 = vadd.f32 %v3147_v41, %v3146_v11  ;;  %v3132_v20 = vld [vmem:[%s4446_s3] sm:$0xff] }
 0x1dd   : > { %v3037_v2 = vmul.f32 %v3755_v27, %v3006_v47  ;;  %v3043_v37 = vsub.f32 1.0, %v3031_v55 }
 0x1de   : > { %v3126_v29 = vsel %vm3078_vm5, %v3118_v26, 0.0  ;;  %v3757_v17 = vpop.eup %3756  ;;  %v3119_v33 = vsub.f32 1.0, %v3107_v14 }
 0x1df   : > { %v3136_v34 = vsub.f32 %v3042_v28, %v3126_v29  ;;  %v3759_v38 = vpop.eup %3758  ;;  %v3113_v13 = vmul.f32 %v3757_v17, %v3090_v50  ;;  %v3046_v7 = vsub.f32 1.0, %v3037_v2 }
 0x1e0   : > { %v3127_v51 = vsel %vm3079_vm6, %v3119_v33, 0.0  ;;  %v3039_v56 = vmul.f32 %v3759_v38, %v3007_v57 }
 0x1e1   : > { %v3144_v6 = vmul.f32 %v3136_v34, %v1991_v3  ;;  %v3761_v49 = vpop.eup %3760  ;;  %v3137_v8 = vsub.f32 %v3043_v37, %v3127_v51  ;;  %v3122_v60 = vsub.f32 1.0, %v3113_v13 }
 0x1e2   : > { %v3115_v25 = vmul.f32 %v3761_v49, %v3091_v48  ;;  %v3047_v1 = vsub.f32 1.0, %v3039_v56 }
 0x1e3   : > { %v3151_v16 = vadd.f32 %v3150_v52, %v3144_v6  ;;  %v3145_v5 = vmul.f32 %v3137_v8, %v1992_v42  ;;  %v3130_v61 = vsel %vm3082_vm7, %v3122_v60, 0.0 }
 0x1e4   : > { %v3123_v22 = vsub.f32 1.0, %v3115_v25  ;;  %v3140_v0 = vsub.f32 %v3046_v7, %v3130_v61 }
 0x1e5   : > { %v3152_v12 = vadd.f32 %v3151_v16, %v3145_v5 }
 0x1e6   : > { %v3131_v59 = vsel %vm3083_vm8, %v3123_v22, 0.0  ;;  %v3148_v62 = vmul.f32 %v3140_v0, %v1995_v9 }
 0x1e7   : > { %3153 = vadd.xlane.f32.xlu0 %v3152_v12  ;;  %v3141_v19 = vsub.f32 %v3047_v1, %v3131_v59 }
 0x1e8   : > { %v3156_v35 = vadd.f32 %v3155_v39, %v3148_v62 }
 0x1e9   : > { %v3149_v24 = vmul.f32 %v3141_v19, %v1996_v10 }
 0x1eb   : > { %v3157_v40 = vadd.f32 %v3156_v35, %v3149_v24 }
 0x1ed   : > { %3158 = vadd.xlane.f32.xlu1 %v3157_v40 }
 0x1fd   : > { %3169 = vrot.lane.b32.xlu0 %v4307_v36, %s3790_s14 }
 0x1fe   : > { %3171 = vrot.lane.b32.xlu1 %v4334_v23, %s3790_s14 }
 0x270   : > { %v3154_v31 = vpop.xlane.xlu0 %3153 }
 0x271   : > { %v3160_v43 = vadd.f32 %v3154_v31, %v3132_v20 }
 0x273   : > { %3163 = vst.msk [vmem:[%s4446_s3] sm:$0xff] %vm3162_vm9, %v3160_v43 }
 0x274   : > { %v3170_v15 = vpop.permute.xlu0 %3169 }
 0x275   : > { %v3175_v36 = vadd.f32 %v3170_v15, %v4222_v63 }
 0x276   : > { %v3159_v44 = vpop.xlane.xlu1 %3158 }
 0x277   : > { %v3161_v23 = vadd.f32 %v3159_v44, %v3133_v54  ;;  %3177 = vst.msk [vmem:[#allocation3] sm:$0xff] %vm3162_vm9, %v3175_v36 }
 0x279   : > { %3164 = vst.msk [vmem:[%s4446_s3 + $0x8] sm:$0xff] %vm3162_vm9, %v3161_v23 }
 0x27a   : > { %v3172_v21 = vpop.permute.xlu1 %3171 }
 0x27b   : > { %v3176_v55 = vadd.f32 %v3172_v21, %v4228_v4 }
 0x27d   : > { %3178 = vst.msk [vmem:[#allocation3 + $0x8] sm:$0xff] %vm3162_vm9, %v3176_v55 }
 0x27e PF: > { %p10_p9 = scmp.ge.s32.totalorder %s3828_s16, 5   ;;  %s4448_s12 = smov %s3780_s13 }
 0x27f   : > { %s4449_s13 = smov %s3837_s19  ;;  %s4450_s14 = smov %s3828_s16 }
 0x280   :  { %12 = sbr.rel (!%p10_p9) target bundleno = 2 (0x2), region = 121 }

</bundles_post_ra>
